<compile_context>
chip_gen: v7x
topology: tpu7x:2x2x1
jax: 0.10.0
libtpu: 0.0.40
codegen_flags: <defaults>
</compile_context>

<pallas_src>
import functools

import jax
import jax.numpy as jnp
from jax.experimental import pallas as pl
from jax.experimental.pallas import tpu as pltpu

BN_EPS = 1e-5
OUT_PAD = 128  # lane-dense padded width of the final (3-channel) output


def _round_up(v, m):
    return -(-v // m) * m


def _vmem_capacity_bytes():
    """Per-core VMEM capacity; conservative default if the query fails."""
    try:
        return int(pltpu.get_tpu_info().vmem_capacity_bytes)
    except Exception:
        return 64 * 1024 * 1024  # v7x per-TC VMEM (smallest of the targets)


def decoder_kernel(x_ref,
                   w1_ref, s1_ref,
                   w2_ref, s2_ref,
                   w3_ref, s3_ref,
                   w4_ref, b4_ref,
                   o_ref):
    """Fused (conv1+bn1+relu) -> (conv2+bn2+relu) -> (conv3+bn3+relu) -> conv4+tanh.

    Weights carry the folded BatchNorm scale; conv bias is folded into the
    per-layer shift. Matmul operands are bf16 (MXU native) with f32
    accumulation; all elementwise math stays f32. x arrives already in bf16.
    """
    h = jnp.dot(x_ref[...], w1_ref[...], preferred_element_type=jnp.float32)
    h = jnp.maximum(h + s1_ref[...], 0.0)                       # bn1 + relu

    h = jnp.dot(h.astype(jnp.bfloat16), w2_ref[...],
                preferred_element_type=jnp.float32)
    h = jnp.maximum(h + s2_ref[...], 0.0)                       # bn2 + relu

    h = jnp.dot(h.astype(jnp.bfloat16), w3_ref[...],
                preferred_element_type=jnp.float32)
    h = jnp.maximum(h + s3_ref[...], 0.0)                       # bn3 + relu

    h = jnp.dot(h.astype(jnp.bfloat16), w4_ref[...],
                preferred_element_type=jnp.float32)
    o_ref[...] = jnp.tanh(h + b4_ref[...]).astype(o_ref.dtype)  # th(conv4)


def mlp_adj_forward(x, kparams, *, tile_m=None, store_dtype=None,
                    single_buffer_weights=True):
    """x: (B, N, nlatent) f32, kparams from fold_params -> (B, N, 3) f32."""
    B, N, C = x.shape
    M = B * N

    cap = _vmem_capacity_bytes()
    if tile_m is None:
        # v5e/v6e have 128 MiB VMEM -> 2048-row tiles; v7x has 64 MiB -> 1024.
        tile_m = 2048 if cap >= 96 * 1024 * 1024 else 1024
    if store_dtype is None:
        # Small-nlatent configs are HBM-bound: halve the padded writeback.
        store_dtype = jnp.bfloat16 if C < 512 else jnp.float32
    out_itemsize = jnp.dtype(store_dtype).itemsize

    # --- Point-tile sizing --------------------------------------------------
    #  * rows a multiple of 128 (>=16 min, for bf16 sublane packing),
    #  * at least 2 grid steps when M allows, so v7x's 2 TensorCores both get
    #    work on the 'parallel' grid axis.
    tm = min(tile_m, _round_up(M, 16))
    if M > 128:
        tm = min(tm, _round_up(pl.cdiv(M, 2), 128))
    tm = _round_up(tm, 128) if tm >= 128 else _round_up(tm, 16)
    M_pad = _round_up(M, tm)
    grid = M_pad // tm

    # Stream x in bf16: the kernel rounds x to bf16 before the first matmul
    # anyway, so this is numerically identical and halves the input DMA.
    x2 = x.reshape(M, C).astype(jnp.bfloat16)
    if M_pad != M:
        x2 = jnp.pad(x2, ((0, M_pad - M), (0, 0)))

    w_bytes = sum(int(p.size) * p.dtype.itemsize for p in kparams)
    flops = 2 * M_pad * (C * C + C * (C // 2) + (C // 2) * (C // 4)
                         + (C // 4) * OUT_PAD)
    cost = pl.CostEstimate(
        flops=flops,
        transcendentals=M_pad * OUT_PAD,                        # tanh
        bytes_accessed=(M_pad * C * 2                           # bf16 x
                        + M_pad * OUT_PAD * out_itemsize        # padded out
                        + w_bytes))

    # VMEM budget: double-buffered bf16 x tiles + double-buffered out tiles +
    # resident weights (single-buffered if Buffered(1) is honored) + f32/bf16
    # intermediates. Capped per-generation at 3/4 of physical VMEM.
    act_bytes = tm * (C + C // 2 + C // 4 + OUT_PAD) * 6
    vmem_est = (2 * tm * C * 2
                + 2 * tm * OUT_PAD * out_itemsize
                + (1 if single_buffer_weights else 2) * w_bytes
                + act_bytes)
    vmem_limit = int(min(max(vmem_est * 3 // 2, 32 * 1024 * 1024),
                         cap * 3 // 4))

    def resident(arr):
        # Full-array block with a constant index_map: fetched once, stays
        # resident in VMEM across the whole grid. Buffered(1) drops the
        # useless second buffer (only the x/out tiles need double-buffering).
        if single_buffer_weights:
            return pl.BlockSpec(arr.shape, lambda i: (0, 0),
                                pipeline_mode=pl.Buffered(1))
        return pl.BlockSpec(arr.shape, lambda i: (0, 0))

    out = pl.pallas_call(
        decoder_kernel,
        out_shape=jax.ShapeDtypeStruct((M_pad, OUT_PAD), store_dtype),
        grid=(grid,),
        in_specs=[pl.BlockSpec((tm, C), lambda i: (i, 0))]
                 + [resident(p) for p in kparams],
        out_specs=pl.BlockSpec((tm, OUT_PAD), lambda i: (i, 0)),
        compiler_params=pltpu.CompilerParams(
            dimension_semantics=("parallel",),
            vmem_limit_bytes=vmem_limit),
        cost_estimate=cost,
    )(x2, *kparams)

    return out[:M, :3].astype(jnp.float32).reshape(B, N, 3)


def make_params(key, nlatent):
    """Deterministic synthetic parameters matching mlpAdj.__init__ shapes.

    Conv1d(cin, cout, 1) weight (cout, cin, 1) is stored as (cin, cout) so the
    math is x @ W. BatchNorm layers carry (gamma, beta, running_mean,
    running_var) rows of shape (1, cout).
    """
    dims = [(nlatent, nlatent),
            (nlatent, nlatent // 2),
            (nlatent // 2, nlatent // 4),
            (nlatent // 4, 3)]
    keys = iter(jax.random.split(key, 4 * 2 + 3 * 4))

    layers = []
    for li, (cin, cout) in enumerate(dims):
        w = jax.random.normal(next(keys), (cin, cout), jnp.float32) / jnp.sqrt(cin)
        b = jax.random.normal(next(keys), (1, cout), jnp.float32) * 0.1
        if li < 3:  # bn1 / bn2 / bn3 (conv4 has no BN)
            gamma = 0.5 + jax.random.uniform(next(keys), (1, cout), jnp.float32)
            beta = jax.random.normal(next(keys), (1, cout), jnp.float32) * 0.1
            rmean = jax.random.normal(next(keys), (1, cout), jnp.float32) * 0.1
            rvar = 0.5 + jax.random.uniform(next(keys), (1, cout), jnp.float32)
            layers.append((w, b, gamma, beta, rmean, rvar))
        else:
            layers.append((w, b))
    return layers


def fold_params(layers):
    """Fold eval-mode BN + conv bias into (bf16 weight, f32 shift) per layer.

    y = ((x@W + b) - mean)/sqrt(var+eps)*gamma + beta
      =  x@(W*scale) + (b*scale + beta - mean*scale),  scale = gamma/sqrt(var+eps)

    The final layer (conv4, no BN) is zero-padded to OUT_PAD lanes so the
    kernel's output store is lane-dense.
    """
    kparams = []
    for li, layer in enumerate(layers):
        if li < 3:
            w, b, gamma, beta, rmean, rvar = layer
            scale = gamma / jnp.sqrt(rvar + BN_EPS)            # (1, cout)
            wf = (w * scale).astype(jnp.bfloat16)              # fold scale into cols
            shift = (b * scale + beta - rmean * scale).astype(jnp.float32)
            kparams += [wf, shift]
        else:
            w, b = layer
            cin, cout = w.shape
            wp = jnp.zeros((cin, OUT_PAD), jnp.float32).at[:, :cout].set(w)
            bp = jnp.zeros((1, OUT_PAD), jnp.float32).at[:, :cout].set(b)
            kparams += [wp.astype(jnp.bfloat16), bp]
    return tuple(kparams)


def mlp_adj_reference(x, layers):
    """Pure-JAX f32 reference of the original PyTorch forward (eval-mode BN)."""
    B, N, C = x.shape
    h = x.reshape(B * N, C)
    for li, layer in enumerate(layers):
        if li < 3:
            w, b, gamma, beta, rmean, rvar = layer
            h = h @ w + b
            h = (h - rmean) / jnp.sqrt(rvar + BN_EPS) * gamma + beta
            h = jnp.maximum(h, 0.0)
        else:
            w, b = layer
            h = jnp.tanh(h @ w + b)
    return h.reshape(B, N, -1)


def mlp_adj_kernel_math_reference(x, kparams, store_dtype=jnp.float32):
    """Pure-JAX emulation of the exact kernel math (bf16 dots, f32 accum)."""
    (w1, s1, w2, s2, w3, s3, w4, b4) = kparams
    B, N, C = x.shape
    h = x.reshape(B * N, C).astype(jnp.bfloat16)
    h = jnp.maximum(jnp.dot(h, w1, preferred_element_type=jnp.float32) + s1, 0.0)
    h = jnp.maximum(jnp.dot(h.astype(jnp.bfloat16), w2,
                            preferred_element_type=jnp.float32) + s2, 0.0)
    h = jnp.maximum(jnp.dot(h.astype(jnp.bfloat16), w3,
                            preferred_element_type=jnp.float32) + s3, 0.0)
    h = jnp.tanh(jnp.dot(h.astype(jnp.bfloat16), w4,
                         preferred_element_type=jnp.float32) + b4)
    h = h.astype(store_dtype).astype(jnp.float32)      # emulate the kernel store
    return h[:, :3].reshape(B, N, 3)


if __name__ == "__main__":
    nlatent = 128            # small synthetic size (module default is 1024)
    B, N = 2, 128            # x: (batch, num_points, nlatent)

    key = jax.random.PRNGKey(0)
    kx, kp = jax.random.split(key)
    x = jax.random.normal(kx, (B, N, nlatent), jnp.float32)
    raw_params = make_params(kp, nlatent)
    kparams = fold_params(raw_params)

    # Same heuristic the wrapper uses for its auto store dtype; passed
    # explicitly so the reference check stays in sync.
    store_dtype = jnp.bfloat16 if nlatent < 512 else jnp.float32

    out = None
    for single_buf in (True, False):
        try:
            fwd = jax.jit(functools.partial(
                mlp_adj_forward, store_dtype=store_dtype,
                single_buffer_weights=single_buf))
            out = jax.block_until_ready(fwd(x, kparams))
            break
        except Exception:
            # TODO(synk): drop this fallback once Buffered(1) single-buffered
            # resident weights are confirmed on every target jaxlib version.
            if not single_buf:
                raise
    assert out.shape == (B, N, 3), out.shape

    # Exact-math check vs a plain-JAX emulation of the kernel (bf16 dots and,
    # for small C, a bf16 output store -> slightly looser tolerance).
    ref_math = mlp_adj_kernel_math_reference(x, kparams, store_dtype)
    tol = 1e-2 if store_dtype == jnp.bfloat16 else 1e-3
    assert jnp.allclose(out, ref_math, atol=tol, rtol=tol), \
        "mismatch vs kernel-math reference"

    # Accuracy sanity check vs the full-precision f32 reference (relaxed
    # tolerance: bf16 matmuls with f32 accumulation + bf16 output store).
    ref_f32 = mlp_adj_reference(x, raw_params)
    assert float(jnp.max(jnp.abs(out - ref_f32))) < 0.1, \
        "bf16 matmul drift too large vs f32 reference"

    print("KERNEL_OK")
</pallas_src>

<mosaic_0001>
module attributes {stable_mosaic.version = 11 : i64} {
  func.func @decoder_kernel(%arg0: i32, %arg1: memref<128x128xbf16, #tpu.memory_space<vmem>>, %arg2: memref<128x128xbf16, #tpu.memory_space<vmem>>, %arg3: memref<1x128xf32, #tpu.memory_space<vmem>>, %arg4: memref<128x64xbf16, #tpu.memory_space<vmem>>, %arg5: memref<1x64xf32, #tpu.memory_space<vmem>>, %arg6: memref<64x32xbf16, #tpu.memory_space<vmem>>, %arg7: memref<1x32xf32, #tpu.memory_space<vmem>>, %arg8: memref<32x128xbf16, #tpu.memory_space<vmem>>, %arg9: memref<1x128xf32, #tpu.memory_space<vmem>>, %arg10: memref<128x128xbf16, #tpu.memory_space<vmem>>) attributes {dimension_semantics = [#tpu.dimension_semantics<parallel>], iteration_bounds = array<i64: 2>, scalar_prefetch = 0 : i64, scratch_operands = 0 : i64, tpu.core_type = #tpu.core_type<tc>, window_params = [{transform_indices = @transform_0, window_bounds = array<i64: 128, 128>}, {pipeline_mode = #tpu.pipeline_mode<synchronous>, transform_indices = @transform_1, window_bounds = array<i64: 128, 128>}, {pipeline_mode = #tpu.pipeline_mode<synchronous>, transform_indices = @transform_2, window_bounds = array<i64: 1, 128>}, {pipeline_mode = #tpu.pipeline_mode<synchronous>, transform_indices = @transform_3, window_bounds = array<i64: 128, 64>}, {pipeline_mode = #tpu.pipeline_mode<synchronous>, transform_indices = @transform_4, window_bounds = array<i64: 1, 64>}, {pipeline_mode = #tpu.pipeline_mode<synchronous>, transform_indices = @transform_5, window_bounds = array<i64: 64, 32>}, {pipeline_mode = #tpu.pipeline_mode<synchronous>, transform_indices = @transform_6, window_bounds = array<i64: 1, 32>}, {pipeline_mode = #tpu.pipeline_mode<synchronous>, transform_indices = @transform_7, window_bounds = array<i64: 32, 128>}, {pipeline_mode = #tpu.pipeline_mode<synchronous>, transform_indices = @transform_8, window_bounds = array<i64: 1, 128>}, {transform_indices = @transform_9, window_bounds = array<i64: 128, 128>}]} {
    %c0 = arith.constant 0 : index
    %c0_0 = arith.constant 0 : index
    %0 = vector.load %arg1[%c0, %c0_0] : memref<128x128xbf16, #tpu.memory_space<vmem>>, vector<128x128xbf16>
    %c0_1 = arith.constant 0 : index
    %c0_2 = arith.constant 0 : index
    %1 = vector.load %arg2[%c0_1, %c0_2] : memref<128x128xbf16, #tpu.memory_space<vmem>>, vector<128x128xbf16>
    %cst = arith.constant dense<0.000000e+00> : vector<128x128xf32>
    %2 = tpu.matmul %0, %1, %cst {dimension_numbers = #tpu.dot_dimension_numbers<[1], [0], [0], [1], [0, 0, 1, 1], [], []>} : vector<128x128xbf16>, vector<128x128xbf16>, vector<128x128xf32> -> vector<128x128xf32>
    %c0_3 = arith.constant 0 : index
    %c0_4 = arith.constant 0 : index
    %3 = vector.load %arg3[%c0_3, %c0_4] : memref<1x128xf32, #tpu.memory_space<vmem>>, vector<1x128xf32>
    %4 = vector.broadcast %3 : vector<1x128xf32> to vector<128x128xf32>
    %5 = arith.addf %2, %4 : vector<128x128xf32>
    %cst_5 = arith.constant 0.000000e+00 : f32
    %6 = vector.broadcast %cst_5 : f32 to vector<128x128xf32>
    %7 = arith.maximumf %5, %6 : vector<128x128xf32>
    %8 = arith.truncf %7 : vector<128x128xf32> to vector<128x128xbf16>
    %c0_6 = arith.constant 0 : index
    %c0_7 = arith.constant 0 : index
    %9 = vector.load %arg4[%c0_6, %c0_7] : memref<128x64xbf16, #tpu.memory_space<vmem>>, vector<128x64xbf16>
    %cst_8 = arith.constant dense<0.000000e+00> : vector<128x64xf32>
    %10 = tpu.matmul %8, %9, %cst_8 {dimension_numbers = #tpu.dot_dimension_numbers<[1], [0], [0], [1], [0, 0, 1, 1], [], []>} : vector<128x128xbf16>, vector<128x64xbf16>, vector<128x64xf32> -> vector<128x64xf32>
    %c0_9 = arith.constant 0 : index
    %c0_10 = arith.constant 0 : index
    %11 = vector.load %arg5[%c0_9, %c0_10] : memref<1x64xf32, #tpu.memory_space<vmem>>, vector<1x64xf32>
    %12 = vector.broadcast %11 : vector<1x64xf32> to vector<128x64xf32>
    %13 = arith.addf %10, %12 : vector<128x64xf32>
    %cst_11 = arith.constant 0.000000e+00 : f32
    %14 = vector.broadcast %cst_11 : f32 to vector<128x64xf32>
    %15 = arith.maximumf %13, %14 : vector<128x64xf32>
    %16 = arith.truncf %15 : vector<128x64xf32> to vector<128x64xbf16>
    %c0_12 = arith.constant 0 : index
    %c0_13 = arith.constant 0 : index
    %17 = vector.load %arg6[%c0_12, %c0_13] : memref<64x32xbf16, #tpu.memory_space<vmem>>, vector<64x32xbf16>
    %cst_14 = arith.constant dense<0.000000e+00> : vector<128x32xf32>
    %18 = tpu.matmul %16, %17, %cst_14 {dimension_numbers = #tpu.dot_dimension_numbers<[1], [0], [0], [1], [0, 0, 1, 1], [], []>} : vector<128x64xbf16>, vector<64x32xbf16>, vector<128x32xf32> -> vector<128x32xf32>
    %c0_15 = arith.constant 0 : index
    %c0_16 = arith.constant 0 : index
    %19 = vector.load %arg7[%c0_15, %c0_16] : memref<1x32xf32, #tpu.memory_space<vmem>>, vector<1x32xf32>
    %20 = vector.broadcast %19 : vector<1x32xf32> to vector<128x32xf32>
    %21 = arith.addf %18, %20 : vector<128x32xf32>
    %cst_17 = arith.constant 0.000000e+00 : f32
    %22 = vector.broadcast %cst_17 : f32 to vector<128x32xf32>
    %23 = arith.maximumf %21, %22 : vector<128x32xf32>
    %24 = arith.truncf %23 : vector<128x32xf32> to vector<128x32xbf16>
    %c0_18 = arith.constant 0 : index
    %c0_19 = arith.constant 0 : index
    %25 = vector.load %arg8[%c0_18, %c0_19] : memref<32x128xbf16, #tpu.memory_space<vmem>>, vector<32x128xbf16>
    %cst_20 = arith.constant dense<0.000000e+00> : vector<128x128xf32>
    %26 = tpu.matmul %24, %25, %cst_20 {dimension_numbers = #tpu.dot_dimension_numbers<[1], [0], [0], [1], [0, 0, 1, 1], [], []>} : vector<128x32xbf16>, vector<32x128xbf16>, vector<128x128xf32> -> vector<128x128xf32>
    %c0_21 = arith.constant 0 : index
    %c0_22 = arith.constant 0 : index
    %27 = vector.load %arg9[%c0_21, %c0_22] : memref<1x128xf32, #tpu.memory_space<vmem>>, vector<1x128xf32>
    %28 = vector.broadcast %27 : vector<1x128xf32> to vector<128x128xf32>
    %29 = arith.addf %26, %28 : vector<128x128xf32>
    %30 = math.tanh %29 : vector<128x128xf32>
    %31 = arith.truncf %30 : vector<128x128xf32> to vector<128x128xbf16>
    %c0_23 = arith.constant 0 : index
    %c0_24 = arith.constant 0 : index
    %32 = vector.load %arg10[%c0_23, %c0_24] : memref<128x128xbf16, #tpu.memory_space<vmem>>, vector<128x128xbf16>
    tpu.vector_store %arg10[%c0_23, %c0_24], %31 {strides = array<i32>} : memref<128x128xbf16, #tpu.memory_space<vmem>>, vector<128x128xbf16>,
    return
  }
  func.func @transform_0(%arg0: i32) -> (i32, i32) {
    %c0_i32 = arith.constant 0 : i32
    %c0_i32_0 = arith.constant 0 : i32
    return %arg0, %c0_i32 : i32, i32
  }
  func.func @transform_1(%arg0: i32) -> (i32, i32) {
    %c0_i32 = arith.constant 0 : i32
    %c0_i32_0 = arith.constant 0 : i32
    %c0_i32_1 = arith.constant 0 : i32
    return %c0_i32, %c0_i32_0 : i32, i32
  }
  func.func @transform_2(%arg0: i32) -> (i32, i32) {
    %c0_i32 = arith.constant 0 : i32
    %c0_i32_0 = arith.constant 0 : i32
    %c0_i32_1 = arith.constant 0 : i32
    return %c0_i32, %c0_i32_0 : i32, i32
  }
  func.func @transform_3(%arg0: i32) -> (i32, i32) {
    %c0_i32 = arith.constant 0 : i32
    %c0_i32_0 = arith.constant 0 : i32
    %c0_i32_1 = arith.constant 0 : i32
    return %c0_i32, %c0_i32_0 : i32, i32
  }
  func.func @transform_4(%arg0: i32) -> (i32, i32) {
    %c0_i32 = arith.constant 0 : i32
    %c0_i32_0 = arith.constant 0 : i32
    %c0_i32_1 = arith.constant 0 : i32
    return %c0_i32, %c0_i32_0 : i32, i32
  }
  func.func @transform_5(%arg0: i32) -> (i32, i32) {
    %c0_i32 = arith.constant 0 : i32
    %c0_i32_0 = arith.constant 0 : i32
    %c0_i32_1 = arith.constant 0 : i32
    return %c0_i32, %c0_i32_0 : i32, i32
  }
  func.func @transform_6(%arg0: i32) -> (i32, i32) {
    %c0_i32 = arith.constant 0 : i32
    %c0_i32_0 = arith.constant 0 : i32
    %c0_i32_1 = arith.constant 0 : i32
    return %c0_i32, %c0_i32_0 : i32, i32
  }
  func.func @transform_7(%arg0: i32) -> (i32, i32) {
    %c0_i32 = arith.constant 0 : i32
    %c0_i32_0 = arith.constant 0 : i32
    %c0_i32_1 = arith.constant 0 : i32
    return %c0_i32, %c0_i32_0 : i32, i32
  }
  func.func @transform_8(%arg0: i32) -> (i32, i32) {
    %c0_i32 = arith.constant 0 : i32
    %c0_i32_0 = arith.constant 0 : i32
    %c0_i32_1 = arith.constant 0 : i32
    return %c0_i32, %c0_i32_0 : i32, i32
  }
  func.func @transform_9(%arg0: i32) -> (i32, i32) {
    %c0_i32 = arith.constant 0 : i32
    %c0_i32_0 = arith.constant 0 : i32
    return %arg0, %c0_i32 : i32, i32
  }
}

module attributes {stable_mosaic.version = 11 : i64} {
  func.func @decoder_kernel(%arg0: i32, %arg1: memref<128x128xbf16, #tpu.memory_space<vmem>>, %arg2: memref<128x128xbf16, #tpu.memory_space<vmem>>, %arg3: memref<1x128xf32, #tpu.memory_space<vmem>>, %arg4: memref<128x64xbf16, #tpu.memory_space<vmem>>, %arg5: memref<1x64xf32, #tpu.memory_space<vmem>>, %arg6: memref<64x32xbf16, #tpu.memory_space<vmem>>, %arg7: memref<1x32xf32, #tpu.memory_space<vmem>>, %arg8: memref<32x128xbf16, #tpu.memory_space<vmem>>, %arg9: memref<1x128xf32, #tpu.memory_space<vmem>>, %arg10: memref<128x128xbf16, #tpu.memory_space<vmem>>) attributes {dimension_semantics = [#tpu.dimension_semantics<parallel>], iteration_bounds = array<i64: 2>, scalar_prefetch = 0 : i64, scratch_operands = 0 : i64, tpu.core_type = #tpu.core_type<tc>, window_params = [{transform_indices = @transform_0, window_bounds = array<i64: 128, 128>}, {pipeline_mode = #tpu.pipeline_mode<synchronous>, transform_indices = @transform_1, window_bounds = array<i64: 128, 128>}, {pipeline_mode = #tpu.pipeline_mode<synchronous>, transform_indices = @transform_2, window_bounds = array<i64: 1, 128>}, {pipeline_mode = #tpu.pipeline_mode<synchronous>, transform_indices = @transform_3, window_bounds = array<i64: 128, 64>}, {pipeline_mode = #tpu.pipeline_mode<synchronous>, transform_indices = @transform_4, window_bounds = array<i64: 1, 64>}, {pipeline_mode = #tpu.pipeline_mode<synchronous>, transform_indices = @transform_5, window_bounds = array<i64: 64, 32>}, {pipeline_mode = #tpu.pipeline_mode<synchronous>, transform_indices = @transform_6, window_bounds = array<i64: 1, 32>}, {pipeline_mode = #tpu.pipeline_mode<synchronous>, transform_indices = @transform_7, window_bounds = array<i64: 32, 128>}, {pipeline_mode = #tpu.pipeline_mode<synchronous>, transform_indices = @transform_8, window_bounds = array<i64: 1, 128>}, {transform_indices = @transform_9, window_bounds = array<i64: 128, 128>}]} {
    %c0 = arith.constant 0 : index
    %c0_0 = arith.constant 0 : index
    %0 = vector.load %arg1[%c0, %c0_0] : memref<128x128xbf16, #tpu.memory_space<vmem>>, vector<128x128xbf16>
    %c0_1 = arith.constant 0 : index
    %c0_2 = arith.constant 0 : index
    %1 = vector.load %arg2[%c0_1, %c0_2] : memref<128x128xbf16, #tpu.memory_space<vmem>>, vector<128x128xbf16>
    %cst = arith.constant dense<0.000000e+00> : vector<128x128xf32>
    %2 = tpu.matmul %0, %1, %cst {dimension_numbers = #tpu.dot_dimension_numbers<[1], [0], [0], [1], [0, 0, 1, 1], [], []>} : vector<128x128xbf16>, vector<128x128xbf16>, vector<128x128xf32> -> vector<128x128xf32>
    %c0_3 = arith.constant 0 : index
    %c0_4 = arith.constant 0 : index
    %3 = vector.load %arg3[%c0_3, %c0_4] : memref<1x128xf32, #tpu.memory_space<vmem>>, vector<1x128xf32>
    %4 = vector.broadcast %3 : vector<1x128xf32> to vector<128x128xf32>
    %5 = arith.addf %2, %4 : vector<128x128xf32>
    %cst_5 = arith.constant 0.000000e+00 : f32
    %6 = vector.broadcast %cst_5 : f32 to vector<128x128xf32>
    %7 = arith.maximumf %5, %6 : vector<128x128xf32>
    %8 = arith.truncf %7 : vector<128x128xf32> to vector<128x128xbf16>
    %c0_6 = arith.constant 0 : index
    %c0_7 = arith.constant 0 : index
    %9 = vector.load %arg4[%c0_6, %c0_7] : memref<128x64xbf16, #tpu.memory_space<vmem>>, vector<128x64xbf16>
    %cst_8 = arith.constant dense<0.000000e+00> : vector<128x64xf32>
    %10 = tpu.matmul %8, %9, %cst_8 {dimension_numbers = #tpu.dot_dimension_numbers<[1], [0], [0], [1], [0, 0, 1, 1], [], []>} : vector<128x128xbf16>, vector<128x64xbf16>, vector<128x64xf32> -> vector<128x64xf32>
    %c0_9 = arith.constant 0 : index
    %c0_10 = arith.constant 0 : index
    %11 = vector.load %arg5[%c0_9, %c0_10] : memref<1x64xf32, #tpu.memory_space<vmem>>, vector<1x64xf32>
    %12 = vector.broadcast %11 : vector<1x64xf32> to vector<128x64xf32>
    %13 = arith.addf %10, %12 : vector<128x64xf32>
    %cst_11 = arith.constant 0.000000e+00 : f32
    %14 = vector.broadcast %cst_11 : f32 to vector<128x64xf32>
    %15 = arith.maximumf %13, %14 : vector<128x64xf32>
    %16 = arith.truncf %15 : vector<128x64xf32> to vector<128x64xbf16>
    %c0_12 = arith.constant 0 : index
    %c0_13 = arith.constant 0 : index
    %17 = vector.load %arg6[%c0_12, %c0_13] : memref<64x32xbf16, #tpu.memory_space<vmem>>, vector<64x32xbf16>
    %cst_14 = arith.constant dense<0.000000e+00> : vector<128x32xf32>
    %18 = tpu.matmul %16, %17, %cst_14 {dimension_numbers = #tpu.dot_dimension_numbers<[1], [0], [0], [1], [0, 0, 1, 1], [], []>} : vector<128x64xbf16>, vector<64x32xbf16>, vector<128x32xf32> -> vector<128x32xf32>
    %c0_15 = arith.constant 0 : index
    %c0_16 = arith.constant 0 : index
    %19 = vector.load %arg7[%c0_15, %c0_16] : memref<1x32xf32, #tpu.memory_space<vmem>>, vector<1x32xf32>
    %20 = vector.broadcast %19 : vector<1x32xf32> to vector<128x32xf32>
    %21 = arith.addf %18, %20 : vector<128x32xf32>
    %cst_17 = arith.constant 0.000000e+00 : f32
    %22 = vector.broadcast %cst_17 : f32 to vector<128x32xf32>
    %23 = arith.maximumf %21, %22 : vector<128x32xf32>
    %24 = arith.truncf %23 : vector<128x32xf32> to vector<128x32xbf16>
    %c0_18 = arith.constant 0 : index
    %c0_19 = arith.constant 0 : index
    %25 = vector.load %arg8[%c0_18, %c0_19] : memref<32x128xbf16, #tpu.memory_space<vmem>>, vector<32x128xbf16>
    %cst_20 = arith.constant dense<0.000000e+00> : vector<128x128xf32>
    %26 = tpu.matmul %24, %25, %cst_20 {dimension_numbers = #tpu.dot_dimension_numbers<[1], [0], [0], [1], [0, 0, 1, 1], [], []>} : vector<128x32xbf16>, vector<32x128xbf16>, vector<128x128xf32> -> vector<128x128xf32>
    %c0_21 = arith.constant 0 : index
    %c0_22 = arith.constant 0 : index
    %27 = vector.load %arg9[%c0_21, %c0_22] : memref<1x128xf32, #tpu.memory_space<vmem>>, vector<1x128xf32>
    %28 = vector.broadcast %27 : vector<1x128xf32> to vector<128x128xf32>
    %29 = arith.addf %26, %28 : vector<128x128xf32>
    %30 = math.tanh %29 : vector<128x128xf32>
    %31 = arith.truncf %30 : vector<128x128xf32> to vector<128x128xbf16>
    %c0_23 = arith.constant 0 : index
    %c0_24 = arith.constant 0 : index
    %32 = vector.load %arg10[%c0_23, %c0_24] : memref<128x128xbf16, #tpu.memory_space<vmem>>, vector<128x128xbf16>
    tpu.vector_store %arg10[%c0_23, %c0_24], %31 {strides = array<i32>} : memref<128x128xbf16, #tpu.memory_space<vmem>>, vector<128x128xbf16>,
    return
  }
  func.func @transform_0(%arg0: i32) -> (i32, i32) {
    %c0_i32 = arith.constant 0 : i32
    %c0_i32_0 = arith.constant 0 : i32
    return %arg0, %c0_i32 : i32, i32
  }
  func.func @transform_1(%arg0: i32) -> (i32, i32) {
    %c0_i32 = arith.constant 0 : i32
    %c0_i32_0 = arith.constant 0 : i32
    %c0_i32_1 = arith.constant 0 : i32
    return %c0_i32, %c0_i32_0 : i32, i32
  }
  func.func @transform_2(%arg0: i32) -> (i32, i32) {
    %c0_i32 = arith.constant 0 : i32
    %c0_i32_0 = arith.constant 0 : i32
    %c0_i32_1 = arith.constant 0 : i32
    return %c0_i32, %c0_i32_0 : i32, i32
  }
  func.func @transform_3(%arg0: i32) -> (i32, i32) {
    %c0_i32 = arith.constant 0 : i32
    %c0_i32_0 = arith.constant 0 : i32
    %c0_i32_1 = arith.constant 0 : i32
    return %c0_i32, %c0_i32_0 : i32, i32
  }
  func.func @transform_4(%arg0: i32) -> (i32, i32) {
    %c0_i32 = arith.constant 0 : i32
    %c0_i32_0 = arith.constant 0 : i32
    %c0_i32_1 = arith.constant 0 : i32
    return %c0_i32, %c0_i32_0 : i32, i32
  }
  func.func @transform_5(%arg0: i32) -> (i32, i32) {
    %c0_i32 = arith.constant 0 : i32
    %c0_i32_0 = arith.constant 0 : i32
    %c0_i32_1 = arith.constant 0 : i32
    return %c0_i32, %c0_i32_0 : i32, i32
  }
  func.func @transform_6(%arg0: i32) -> (i32, i32) {
    %c0_i32 = arith.constant 0 : i32
    %c0_i32_0 = arith.constant 0 : i32
    %c0_i32_1 = arith.constant 0 : i32
    return %c0_i32, %c0_i32_0 : i32, i32
  }
  func.func @transform_7(%arg0: i32) -> (i32, i32) {
    %c0_i32 = arith.constant 0 : i32
    %c0_i32_0 = arith.constant 0 : i32
    %c0_i32_1 = arith.constant 0 : i32
    return %c0_i32, %c0_i32_0 : i32, i32
  }
  func.func @transform_8(%arg0: i32) -> (i32, i32) {
    %c0_i32 = arith.constant 0 : i32
    %c0_i32_0 = arith.constant 0 : i32
    %c0_i32_1 = arith.constant 0 : i32
    return %c0_i32, %c0_i32_0 : i32, i32
  }
  func.func @transform_9(%arg0: i32) -> (i32, i32) {
    %c0_i32 = arith.constant 0 : i32
    %c0_i32_0 = arith.constant 0 : i32
    return %arg0, %c0_i32 : i32, i32
  }
}

</mosaic_0001>

<bundles_post_ra>
// kernel: mlp_adj_forward.1
= control target key start
LH: loop header
LB: loop body
LE: loop exit
PB: predicated region body
PF: predicated region fallthrough
CT: control target
= control target key end

     0   :  { %s1697_s30 = smov 0   ;;  %s1853_s0 = inlined_call_operand.vmem [shape: bf16[256,128], index: 0, kind: input, shape index: {}]   ;;  %s1854_s1 = inlined_call_operand.vmem [shape: bf16[128,128], index: 1, kind: input, shape index: {}]   ;;  %s1855_s2 = inlined_call_operand.vmem [shape: f32[1,128], index: 2, kind: input, shape index: {}]   ;;  %s1856_s3 = inlined_call_operand.vmem [shape: bf16[128,64], index: 3, kind: input, shape index: {}]   ;;  %s1857_s4 = inlined_call_operand.vmem [shape: f32[1,64], index: 4, kind: input, shape index: {}]   ;;  %s1858_s5 = inlined_call_operand.vmem [shape: bf16[64,32], index: 5, kind: input, shape index: {}]   ;;  %s1859_s6 = inlined_call_operand.vmem [shape: f32[1,32], index: 6, kind: input, shape index: {}]   ;;  %s1860_s7 = inlined_call_operand.vmem [shape: bf16[32,128], index: 7, kind: input, shape index: {}]   ;;  %s1861_s8 = inlined_call_operand.vmem [shape: f32[1,128], index: 8, kind: input, shape index: {}]   ;;  %s1862_s9 = inlined_call_operand.vmem [shape: bf16[256,128], index: 9, kind: output, shape index: {}]  }
   0x1 LB: > { %s1267_s10 = sadd.s32 4294967295, %s1645_s30   ;;  %p1271_p0 = scmp.ge.s32.totalorder %s1645_s30, 1  ;;  %s1645_s30 = sphi %s1697_s30, %s19_s30  }
   0x2   : > { %p288_p1 = scmp.lt.s32.totalorder %s1645_s30, 3 }
   0x4   : > { %p289_p2 = pnand %p1271_p0, %p288_p1 }
   0x5   : > { %v1577_v0 = vld [vmem:[%s1854_s1] sm:$0xff] (!%p289_p2)   ;;  %s1272_s13 = sshll.u32 (!%p289_p2), %s1267_s10, 4  ;;  %v1578_v1 = vld [vmem:[%s1854_s1 + $0x8] sm:$0xff] (!%p289_p2)   ;;  %v1579_v2 = vld [vmem:[%s1854_s1 + $0x10] sm:$0xff] (!%p289_p2)   ;;  %vm824_vm0 = vcmask (!%p289_p2), 523264   ;;  %vm993_vm1 = vcmask (!%p289_p2), 261120  }
   0x6   : > { %292 = sbr.rel (%p289_p2) target bundleno = 959 (0x3bf), region = 56  ;;  %p325_p3 = scmp.lt.s32.totalorder (!%p289_p2), %s1272_s13, 31  ;;  %1461 = vmatprep.subr.bf16.mxu0 (!%p289_p2), %v1577_v0  ;;  %v1580_v3 = vld [vmem:[%s1854_s1 + $0x18] sm:$0xff] (!%p289_p2)   ;;  %v1581_v5 = vld [vmem:[%s1854_s1 + $0x20] sm:$0xff] (!%p289_p2)   ;;  %v1582_v6 = vld [vmem:[%s1854_s1 + $0x28] sm:$0xff] (!%p289_p2)  }
   0x7   : > { %1462 = vmatpush3.bf16.msra.mxu0 (!%p289_p2), %v1577_v0  ;;  %v1593_v7 = vld [vmem:[%s1856_s3] sm:$0xff] (!%p289_p2)   ;;  %v1594_v8 = vld [vmem:[%s1856_s3 + $0x8] sm:$0xff] (!%p289_p2)   ;;  %v1583_v9 = vld [vmem:[%s1854_s1 + $0x30] sm:$0xff] (!%p289_p2)  }
   0x8   : > { %1463 = vmatprep.subr.bf16.mxu0 (!%p289_p2), %v1578_v1  ;;  %1493 = vmatprep.subr.bf16.mxu1 (!%p289_p2), %v1593_v7  ;;  %v1595_v10 = vld [vmem:[%s1856_s3 + $0x10] sm:$0xff] (!%p289_p2)   ;;  %v1584_v11 = vld [vmem:[%s1854_s1 + $0x38] sm:$0xff] (!%p289_p2)   ;;  %v1597_v13 = vld [vmem:[%s1856_s3 + $0x20] sm:$0xff] (!%p289_p2)  }
   0x9   : > { %1494 = vmatpush3.bf16.msra.mxu1 (!%p289_p2), %v1593_v7  ;;  %v1596_v12 = vld [vmem:[%s1856_s3 + $0x18] sm:$0xff] (!%p289_p2)   ;;  %v1598_v16 = vld [vmem:[%s1856_s3 + $0x28] sm:$0xff] (!%p289_p2)   ;;  %v1599_v22 = vld [vmem:[%s1856_s3 + $0x30] sm:$0xff] (!%p289_p2)  }
   0xa   : > { %1495 = vmatprep.subr.bf16.mxu1 (!%p289_p2), %v1594_v8  ;;  %v1600_v23 = vld [vmem:[%s1856_s3 + $0x38] sm:$0xff] (!%p289_p2)   ;;  %v1601_v24 = vld [vmem:[%s1858_s5] sm:$0xff] (!%p289_p2)   ;;  %v1602_v25 = vld [vmem:[%s1858_s5 + $0x8] sm:$0xff] (!%p289_p2)  }
   0xb   : > { %1464 = vmatpush3.bf16.msra.mxu0 (!%p289_p2), %v1578_v1  ;;  %v1603_v26 = vld [vmem:[%s1858_s5 + $0x10] sm:$0xff] (!%p289_p2)   ;;  %v1276_v27 = vld [vmem:[%s1855_s2] ss:$0 sm:$0xff] (!%p289_p2) }
   0xc   : > { %1465 = vmatprep.subr.bf16.mxu0 (!%p289_p2), %v1579_v2 }
   0xd   : > { %s1864_s13 = smov (!%p325_p3, %s1272_s13), 31  ;;  %1496 = vmatpush3.bf16.msra.mxu1 %v1594_v8 }
   0xe   : > { %s1273_s18 = sshll.u32 %s1864_s13, 2  ;;  %1497 = vmatprep.subr.bf16.mxu1 %v1595_v10 }
   0xf   : > { %s1722_s21 = scalar_lea.vmem %s1853_s0, %s1273_s18  ;;  %1466 = vmatpush3.bf16.msra.mxu0 %v1579_v2 }
  0x10   : > { %v1585_v4 = vld [vmem:[%s1722_s21] sm:$0xff]   ;;  %1467 = vmatprep.subr.bf16.mxu0 %v1580_v3  ;;  %v1586_v14 = vld [vmem:[%s1722_s21 + $0x8] sm:$0xff]   ;;  %v1587_v15 = vld [vmem:[%s1722_s21 + $0x10] sm:$0xff]  }
  0x11   : > { %1477 = vmatprep.mubr.bf16.mxu0 %v1585_v4  ;;  %1498 = vmatpush3.bf16.msra.mxu1 %v1595_v10  ;;  %v1588_v17 = vld [vmem:[%s1722_s21 + $0x18] sm:$0xff]   ;;  %v1589_v18 = vld [vmem:[%s1722_s21 + $0x20] sm:$0xff]   ;;  %v1590_v19 = vld [vmem:[%s1722_s21 + $0x28] sm:$0xff]  }
  0x12   : > { %1499 = vmatprep.subr.bf16.mxu1 %v1596_v12  ;;  %v1591_v20 = vld [vmem:[%s1722_s21 + $0x30] sm:$0xff]   ;;  %v1592_v21 = vld [vmem:[%s1722_s21 + $0x38] sm:$0xff]   ;;  %s1832_s21 = scalar_lea.vmem %s1862_s9, %s1273_s18 }
  0x13   : > { %1468 = vmatpush3.bf16.msra.mxu0 %v1580_v3 }
  0x14   : > { %1469 = vmatprep.subr.bf16.mxu0 %v1581_v5 }
  0x15   : > { %1500 = vmatpush3.bf16.msra.mxu1 %v1596_v12 }
  0x16   : > { %1501 = vmatprep.subr.bf16.mxu1 %v1597_v13 }
  0x17   : > { %1470 = vmatpush3.bf16.msra.mxu0 %v1581_v5 }
  0x18   : > { %1471 = vmatprep.subr.bf16.mxu0 %v1582_v6 }
  0x19   : > { %1502 = vmatpush3.bf16.msra.mxu1 %v1597_v13 }
  0x1a   : > { %1503 = vmatprep.subr.bf16.mxu1 %v1598_v16 }
  0x1b   : > { %1472 = vmatpush3.bf16.msra.mxu0 %v1582_v6 }
  0x1c   : > { %1473 = vmatprep.subr.bf16.mxu0 %v1583_v9 }
  0x1d   : > { %1504 = vmatpush3.bf16.msra.mxu1 %v1598_v16 }
  0x1e   : > { %1505 = vmatprep.subr.bf16.mxu1 %v1599_v22 }
  0x1f   : > { %1474 = vmatpush3.bf16.msra.mxu0 %v1583_v9 }
  0x20   : > { %1475 = vmatprep.subr.bf16.mxu0 %v1584_v11 }
  0x21   : > { %1506 = vmatpush3.bf16.msra.mxu1 %v1599_v22  ;;  %v1606_v22 = vld [vmem:[%s1860_s7 + $0x8] sm:$0xff]  }
  0x22   : > { %1507 = vmatprep.subr.bf16.mxu1 %v1600_v23 }
  0x23   : > { %1476 = vmatpush3.bf16.msra.mxu0 %v1584_v11 }
  0x24   : > { %1525 = vmatprep.subr.bf16.mxu0 %v1601_v24 }
  0x25   : > { %1508 = vmatpush3.bf16.msra.mxu1 %v1600_v23  ;;  %v1293_v23 = vld [vmem:[%s1857_s4] ss:$0 sm:$0xff] }
  0x26   : > { %1478 = vmatmul.mubr.bf16.vlgmr.msra.gmra.mrb[0].mxu0 %v1586_v14 }
  0x27   : > { %1481 = vmatprep.mubr.bf16.mxu0 %v1587_v15  ;;  %1526 = vmatpush3.bf16.msra.mxu0 %v1601_v24 }
  0x28   : > { %1527 = vmatprep.subr.bf16.mxu0 %v1602_v25 }
  0x2b   : > { %1528 = vmatpush3.bf16.msra.mxu0 %v1602_v25 }
  0x2c   : > { %1529 = vmatprep.subr.bf16.mxu0 %v1603_v26 }
  0x2e   : > { %1482 = vmatmul.mubr.bf16.gmra.mrb[4].mxu0 %v1588_v17 }
  0x2f   : > { %1485 = vmatprep.mubr.bf16.mxu0 %v1589_v18  ;;  %1530 = vmatpush3.bf16.msra.mxu0 %v1603_v26 }
  0x36   : > { %1486 = vmatmul.mubr.bf16.gmra.mrb[8].mxu0 %v1590_v19 }
  0x37   : > { %1489 = vmatprep.mubr.bf16.mxu0 %v1591_v20  ;;  %v1604_v20 = vld [vmem:[%s1858_s5 + $0x18] sm:$0xff]  }
  0x38   : > { %1531 = vmatprep.subr.bf16.mxu0 %v1604_v20 }
  0x39   : > { %1532 = vmatpush3.bf16.msra.mxu0 %v1604_v20 }
  0x3e   : > { %1490 = vmatmul.mubr.bf16.gmra.mrb[12].mxu0 %v1592_v21  ;;  %v1605_v21 = vld [vmem:[%s1860_s7] sm:$0xff]  }
  0x3f   : > { %1549 = vmatprep.subr.bf16.mxu1 %v1605_v21 }
  0xf9   : > { %v1479_v28 = vpop.f32.mrb[0].mxu0 }
  0xfa   : > { %v515_v29 = vadd.f32 %v1479_v28, %v1276_v27  ;;  %v506_v30 = vpop.f32.mrb[1].mxu0 }
  0xfb   : > { %v507_v31 = vadd.f32 %v1276_v27, %v506_v30  ;;  %v1480_v32 = vpop.f32.mrb[2].mxu0 }
  0xfc   : > { %v518_v33 = vadd.f32 %v1480_v32, %v1276_v27  ;;  %v509_v34 = vpop.f32.mrb[3].mxu0  ;;  %v571_v36 = vmax.f32 %v515_v29, 0.0 }
  0xfd   : > { %v510_v35 = vadd.f32 %v1276_v27, %v509_v34  ;;  %v569_v38 = vmax.f32 %v507_v31, 0.0 }
  0xfe   : > { %v572_v37 = vmax.f32 %v518_v33, 0.0 }
  0xff   : > { %v570_v39 = vmax.f32 %v510_v35, 0.0 }
 0x100   : > { %v586_v40 = vpack.c.bf16 %v572_v37, %v571_v36 }
 0x101   : > { %v1483_v41 = vpop.f32.mrb[4].mxu0  ;;  %v585_v42 = vpack.c.bf16 %v570_v39, %v569_v38 }
 0x102   : > { %v531_v43 = vadd.f32 %v1483_v41, %v1276_v27  ;;  %v522_v44 = vpop.f32.mrb[5].mxu0 }
 0x103   : > { %v523_v45 = vadd.f32 %v1276_v27, %v522_v44  ;;  %v1484_v46 = vpop.f32.mrb[6].mxu0  ;;  %1509 = vmatprep.mubr.bf16.mxu1 %v585_v42 }
 0x104   : > { %v534_v47 = vadd.f32 %v1484_v46, %v1276_v27  ;;  %v525_v48 = vpop.f32.mrb[7].mxu0  ;;  %1510 = vmatmul.mubr.bf16.vlgmr.msra.gmra.mrb[0].mxu1 %v586_v40  ;;  %v575_v50 = vmax.f32 %v531_v43, 0.0 }
 0x105   : > { %v526_v49 = vadd.f32 %v1276_v27, %v525_v48  ;;  %v573_v52 = vmax.f32 %v523_v45, 0.0  ;;  %1550 = vmatpush3.bf16.msra.mxu1 %v1605_v21 }
 0x106   : > { %v576_v51 = vmax.f32 %v534_v47, 0.0  ;;  %1551 = vmatprep.subr.bf16.mxu1 %v1606_v22 }
 0x107   : > { %v574_v53 = vmax.f32 %v526_v49, 0.0 }
 0x108   : > { %v588_v54 = vpack.c.bf16 %v576_v51, %v575_v50 }
 0x109   : > { %v587_v55 = vpack.c.bf16 %v574_v53, %v573_v52  ;;  %v1487_v56 = vpop.f32.mrb[8].mxu0  ;;  %1552 = vmatpush3.bf16.msra.mxu1 %v1606_v22 }
 0x10a   : > { %v547_v57 = vadd.f32 %v1487_v56, %v1276_v27  ;;  %v538_v58 = vpop.f32.mrb[9].mxu0 }
 0x10b   : > { %v539_v59 = vadd.f32 %v1276_v27, %v538_v58  ;;  %v1488_v60 = vpop.f32.mrb[10].mxu0  ;;  %1513 = vmatprep.mubr.bf16.mxu1 %v587_v55 }
 0x10c   : > { %v550_v61 = vadd.f32 %v1488_v60, %v1276_v27  ;;  %v541_v62 = vpop.f32.mrb[11].mxu0  ;;  %1514 = vmatmul.mubr.bf16.gmra.mrb[4].mxu1 %v588_v54  ;;  %v579_v0 = vmax.f32 %v547_v57, 0.0 }
 0x10d   : > { %v542_v63 = vadd.f32 %v1276_v27, %v541_v62  ;;  %v577_v2 = vmax.f32 %v539_v59, 0.0 }
 0x10e   : > { %v580_v1 = vmax.f32 %v550_v61, 0.0 }
 0x10f   : > { %v578_v3 = vmax.f32 %v542_v63, 0.0 }
 0x110   : > { %v590_v4 = vpack.c.bf16 %v580_v1, %v579_v0 }
 0x111   : > { %v589_v5 = vpack.c.bf16 %v578_v3, %v577_v2  ;;  %v1491_v6 = vpop.f32.mrb[12].mxu0 }
 0x112   : > { %v563_v7 = vadd.f32 %v1491_v6, %v1276_v27  ;;  %v554_v8 = vpop.f32.mrb[13].mxu0 }
 0x113   : > { %v555_v9 = vadd.f32 %v1276_v27, %v554_v8  ;;  %v1492_v10 = vpop.f32.mrb[14].mxu0  ;;  %1517 = vmatprep.mubr.bf16.mxu1 %v589_v5 }
 0x114   : > { %v566_v11 = vadd.f32 %v1492_v10, %v1276_v27  ;;  %v557_v12 = vpop.f32.mrb[15].mxu0  ;;  %1518 = vmatmul.mubr.bf16.gmra.mrb[8].mxu1 %v590_v4  ;;  %v583_v14 = vmax.f32 %v563_v7, 0.0 }
 0x115   : > { %v558_v13 = vadd.f32 %v1276_v27, %v557_v12  ;;  %v581_v16 = vmax.f32 %v555_v9, 0.0 }
 0x116   : > { %v584_v15 = vmax.f32 %v566_v11, 0.0 }
 0x117   : > { %v582_v17 = vmax.f32 %v558_v13, 0.0 }
 0x118   : > { %v592_v18 = vpack.c.bf16 %v584_v15, %v583_v14 }
 0x119   : > { %v591_v19 = vpack.c.bf16 %v582_v17, %v581_v16  ;;  %v1302_v16 = vld [vmem:[%s1859_s6] ss:$0 sm:$0xff] }
 0x11b   : > { %1521 = vmatprep.mubr.bf16.mxu1 %v591_v19 }
 0x11c   : > { %1522 = vmatmul.mubr.bf16.gmra.mrb[12].mxu1 %v592_v18 }
 0x1d7   : > { %v1511_v24 = vpop.f32.mrb[0].mxu1 }
 0x1d8   : > { %v707_v25 = vadd.f32 %v1511_v24, %v1293_v23  ;;  %v698_v26 = vpop.f32.mrb[1].mxu1 }
 0x1d9   : > { %v699_v27 = vadd.f32 %v1293_v23, %v698_v26  ;;  %v1512_v28 = vpop.f32.mrb[2].mxu1 }
 0x1da   : > { %v710_v29 = vadd.f32 %v1512_v28, %v1293_v23  ;;  %v701_v30 = vpop.f32.mrb[3].mxu1  ;;  %v763_v32 = vmax.f32 %v707_v25, 0.0 }
 0x1db   : > { %v702_v31 = vadd.f32 %v1293_v23, %v701_v30  ;;  %v761_v34 = vmax.f32 %v699_v27, 0.0 }
 0x1dc   : > { %v764_v33 = vmax.f32 %v710_v29, 0.0 }
 0x1dd   : > { %v762_v35 = vmax.f32 %v702_v31, 0.0 }
 0x1de   : > { %v778_v36 = vpack.c.bf16 %v764_v33, %v763_v32 }
 0x1df   : > { %v777_v37 = vpack.c.bf16 %v762_v35, %v761_v34  ;;  %v1515_v38 = vpop.f32.mrb[4].mxu1 }
 0x1e0   : > { %v723_v39 = vadd.f32 %v1515_v38, %v1293_v23  ;;  %v714_v40 = vpop.f32.mrb[5].mxu1 }
 0x1e1   : > { %v715_v41 = vadd.f32 %v1293_v23, %v714_v40  ;;  %v1516_v42 = vpop.f32.mrb[6].mxu1  ;;  %1533 = vmatprep.mubr.msk.bf16.mxu0 %vm824_vm0, %v777_v37 }
 0x1e2   : > { %v726_v43 = vadd.f32 %v1516_v42, %v1293_v23  ;;  %v717_v44 = vpop.f32.mrb[7].mxu1  ;;  %1534 = vmatmul.mubr.msk.bf16.vlgmr.msra.gmra.mrb[16].mxu0 %vm824_vm0, %v778_v36  ;;  %v767_v46 = vmax.f32 %v723_v39, 0.0 }
 0x1e3   : > { %v718_v45 = vadd.f32 %v1293_v23, %v717_v44  ;;  %v765_v48 = vmax.f32 %v715_v41, 0.0 }
 0x1e4   : > { %v768_v47 = vmax.f32 %v726_v43, 0.0 }
 0x1e5   : > { %v766_v49 = vmax.f32 %v718_v45, 0.0 }
 0x1e6   : > { %v780_v50 = vpack.c.bf16 %v768_v47, %v767_v46 }
 0x1e7   : > { %v779_v51 = vpack.c.bf16 %v766_v49, %v765_v48  ;;  %v1519_v52 = vpop.f32.mrb[8].mxu1 }
 0x1e8   : > { %v739_v53 = vadd.f32 %v1519_v52, %v1293_v23  ;;  %v730_v54 = vpop.f32.mrb[9].mxu1 }
 0x1e9   : > { %v731_v55 = vadd.f32 %v1293_v23, %v730_v54  ;;  %v1520_v56 = vpop.f32.mrb[10].mxu1  ;;  %1537 = vmatprep.mubr.msk.bf16.mxu0 %vm824_vm0, %v779_v51 }
 0x1ea   : > { %v742_v57 = vadd.f32 %v1520_v56, %v1293_v23  ;;  %v733_v58 = vpop.f32.mrb[11].mxu1  ;;  %1538 = vmatmul.mubr.msk.bf16.gmra.mrb[20].mxu0 %vm824_vm0, %v780_v50  ;;  %v771_v60 = vmax.f32 %v739_v53, 0.0 }
 0x1eb   : > { %v734_v59 = vadd.f32 %v1293_v23, %v733_v58  ;;  %v769_v62 = vmax.f32 %v731_v55, 0.0 }
 0x1ec   : > { %v772_v61 = vmax.f32 %v742_v57, 0.0 }
 0x1ed   : > { %v770_v63 = vmax.f32 %v734_v59, 0.0 }
 0x1ee   : > { %v782_v0 = vpack.c.bf16 %v772_v61, %v771_v60 }
 0x1ef   : > { %v781_v1 = vpack.c.bf16 %v770_v63, %v769_v62  ;;  %v1523_v2 = vpop.f32.mrb[12].mxu1 }
 0x1f0   : > { %v755_v3 = vadd.f32 %v1523_v2, %v1293_v23  ;;  %v746_v4 = vpop.f32.mrb[13].mxu1 }
 0x1f1   : > { %v747_v5 = vadd.f32 %v1293_v23, %v746_v4  ;;  %v1524_v6 = vpop.f32.mrb[14].mxu1  ;;  %1541 = vmatprep.mubr.msk.bf16.mxu0 %vm824_vm0, %v781_v1 }
 0x1f2   : > { %v758_v7 = vadd.f32 %v1524_v6, %v1293_v23  ;;  %v749_v8 = vpop.f32.mrb[15].mxu1  ;;  %1542 = vmatmul.mubr.msk.bf16.gmra.mrb[24].mxu0 %vm824_vm0, %v782_v0  ;;  %v775_v10 = vmax.f32 %v755_v3, 0.0 }
 0x1f3   : > { %v750_v9 = vadd.f32 %v1293_v23, %v749_v8  ;;  %v773_v12 = vmax.f32 %v747_v5, 0.0 }
 0x1f4   : > { %v776_v11 = vmax.f32 %v758_v7, 0.0 }
 0x1f5   : > { %v774_v13 = vmax.f32 %v750_v9, 0.0  ;;  %v1817_v9 = vld [vmem:[%s1861_s8] ss:$0 sm:$0xff] }
 0x1f6   : > { %v784_v14 = vpack.c.bf16 %v776_v11, %v775_v10 }
 0x1f7   : > { %v783_v15 = vpack.c.bf16 %v774_v13, %v773_v12 }
 0x1f9   : > { %1545 = vmatprep.mubr.msk.bf16.mxu0 %vm824_vm0, %v783_v15 }
 0x1fa   : > { %1546 = vmatmul.mubr.msk.bf16.gmra.mrb[28].mxu0 %vm824_vm0, %v784_v14 }
 0x2b5   : > { %v1535_v17 = vpop.f32.mrb[16].mxu0 }
 0x2b6   : > { %v892_v18 = vadd.f32 %v1535_v17, %v1302_v16  ;;  %v883_v19 = vpop.f32.mrb[17].mxu0 }
 0x2b7   : > { %v884_v20 = vadd.f32 %v1302_v16, %v883_v19  ;;  %v1536_v21 = vpop.f32.mrb[18].mxu0 }
 0x2b8   : > { %v895_v22 = vadd.f32 %v1536_v21, %v1302_v16  ;;  %v886_v23 = vpop.f32.mrb[19].mxu0  ;;  %v948_v25 = vmax.f32 %v892_v18, 0.0 }
 0x2b9   : > { %v887_v24 = vadd.f32 %v1302_v16, %v886_v23  ;;  %v946_v27 = vmax.f32 %v884_v20, 0.0 }
 0x2ba   : > { %v949_v26 = vmax.f32 %v895_v22, 0.0 }
 0x2bb   : > { %v947_v28 = vmax.f32 %v887_v24, 0.0 }
 0x2bc   : > { %v963_v29 = vpack.c.bf16 %v949_v26, %v948_v25 }
 0x2bd   : > { %v962_v30 = vpack.c.bf16 %v947_v28, %v946_v27  ;;  %v1539_v31 = vpop.f32.mrb[20].mxu0 }
 0x2be   : > { %v908_v32 = vadd.f32 %v1539_v31, %v1302_v16  ;;  %v899_v33 = vpop.f32.mrb[21].mxu0 }
 0x2bf   : > { %v900_v34 = vadd.f32 %v1302_v16, %v899_v33  ;;  %v1540_v35 = vpop.f32.mrb[22].mxu0  ;;  %1553 = vmatprep.mubr.msk.bf16.mxu1 %vm993_vm1, %v962_v30 }
 0x2c0   : > { %v911_v36 = vadd.f32 %v1540_v35, %v1302_v16  ;;  %v902_v37 = vpop.f32.mrb[23].mxu0  ;;  %1554 = vmatmul.mubr.msk.bf16.vlgmr.msra.gmra.mrb[16].mxu1 %vm993_vm1, %v963_v29  ;;  %v952_v39 = vmax.f32 %v908_v32, 0.0 }
 0x2c1   : > { %v903_v38 = vadd.f32 %v1302_v16, %v902_v37  ;;  %v950_v41 = vmax.f32 %v900_v34, 0.0 }
 0x2c2   : > { %v953_v40 = vmax.f32 %v911_v36, 0.0 }
 0x2c3   : > { %v951_v42 = vmax.f32 %v903_v38, 0.0 }
 0x2c4   : > { %v965_v43 = vpack.c.bf16 %v953_v40, %v952_v39 }
 0x2c5   : > { %v964_v44 = vpack.c.bf16 %v951_v42, %v950_v41  ;;  %v1543_v45 = vpop.f32.mrb[24].mxu0 }
 0x2c6   : > { %v924_v46 = vadd.f32 %v1543_v45, %v1302_v16  ;;  %v915_v47 = vpop.f32.mrb[25].mxu0 }
 0x2c7   : > { %v916_v48 = vadd.f32 %v1302_v16, %v915_v47  ;;  %v1544_v49 = vpop.f32.mrb[26].mxu0  ;;  %1557 = vmatprep.mubr.msk.bf16.mxu1 %vm993_vm1, %v964_v44 }
 0x2c8   : > { %v927_v50 = vadd.f32 %v1544_v49, %v1302_v16  ;;  %v918_v51 = vpop.f32.mrb[27].mxu0  ;;  %1558 = vmatmul.mubr.msk.bf16.gmra.mrb[20].mxu1 %vm993_vm1, %v965_v43  ;;  %v956_v53 = vmax.f32 %v924_v46, 0.0 }
 0x2c9   : > { %v919_v52 = vadd.f32 %v1302_v16, %v918_v51  ;;  %v954_v55 = vmax.f32 %v916_v48, 0.0 }
 0x2ca   : > { %v957_v54 = vmax.f32 %v927_v50, 0.0 }
 0x2cb   : > { %v955_v56 = vmax.f32 %v919_v52, 0.0 }
 0x2cc   : > { %v967_v57 = vpack.c.bf16 %v957_v54, %v956_v53 }
 0x2cd   : > { %v966_v58 = vpack.c.bf16 %v955_v56, %v954_v55  ;;  %v1547_v59 = vpop.f32.mrb[28].mxu0 }
 0x2ce   : > { %v940_v60 = vadd.f32 %v1547_v59, %v1302_v16  ;;  %v931_v61 = vpop.f32.mrb[29].mxu0 }
 0x2cf   : > { %v932_v62 = vadd.f32 %v1302_v16, %v931_v61  ;;  %v1548_v63 = vpop.f32.mrb[30].mxu0  ;;  %1561 = vmatprep.mubr.msk.bf16.mxu1 %vm993_vm1, %v966_v58 }
 0x2d0   : > { %v943_v0 = vadd.f32 %v1548_v63, %v1302_v16  ;;  %v934_v1 = vpop.f32.mrb[31].mxu0  ;;  %1562 = vmatmul.mubr.msk.bf16.gmra.mrb[24].mxu1 %vm993_vm1, %v967_v57  ;;  %v960_v3 = vmax.f32 %v940_v60, 0.0 }
 0x2d1   : > { %v935_v2 = vadd.f32 %v1302_v16, %v934_v1  ;;  %v958_v5 = vmax.f32 %v932_v62, 0.0 }
 0x2d2   : > { %v961_v4 = vmax.f32 %v943_v0, 0.0 }
 0x2d3   : > { %v959_v6 = vmax.f32 %v935_v2, 0.0 }
 0x2d4   : > { %v969_v7 = vpack.c.bf16 %v961_v4, %v960_v3 }
 0x2d5   : > { %v968_v8 = vpack.c.bf16 %v959_v6, %v958_v5 }
 0x2d7   : > { %1565 = vmatprep.mubr.msk.bf16.mxu1 %vm993_vm1, %v968_v8 }
 0x2d8   : > { %1566 = vmatmul.mubr.msk.bf16.gmra.mrb[28].mxu1 %vm993_vm1, %v969_v7 }
 0x393   : > { %v1555_v10 = vpop.f32.mrb[16].mxu1 }
 0x394   : > { %v1061_v11 = vadd.f32 %v1555_v10, %v1817_v9  ;;  %v1052_v12 = vpop.f32.mrb[17].mxu1 }
 0x395   : > { %v1053_v13 = vadd.f32 %v1817_v9, %v1052_v12  ;;  %v1556_v14 = vpop.f32.mrb[18].mxu1 }
 0x396   : > { %1607 = vtanh.f32 %v1061_v11  ;;  %v1064_v15 = vadd.f32 %v1556_v14, %v1817_v9  ;;  %v1055_v16 = vpop.f32.mrb[19].mxu1 }
 0x397   : > { %1609 = vtanh.f32 %v1053_v13  ;;  %v1056_v17 = vadd.f32 %v1817_v9, %v1055_v16 }
 0x398   : > { %1611 = vtanh.f32 %v1064_v15 }
 0x399   : > { %1613 = vtanh.f32 %v1056_v17 }
 0x39b   : > { %v1559_v18 = vpop.f32.mrb[20].mxu1 }
 0x39c   : > { %v1077_v19 = vadd.f32 %v1559_v18, %v1817_v9  ;;  %v1068_v20 = vpop.f32.mrb[21].mxu1 }
 0x39d   : > { %v1069_v21 = vadd.f32 %v1817_v9, %v1068_v20  ;;  %v1560_v22 = vpop.f32.mrb[22].mxu1 }
 0x39e   : > { %1615 = vtanh.f32 %v1077_v19  ;;  %v1080_v23 = vadd.f32 %v1560_v22, %v1817_v9  ;;  %v1071_v24 = vpop.f32.mrb[23].mxu1 }
 0x39f   : > { %1617 = vtanh.f32 %v1069_v21  ;;  %v1072_v25 = vadd.f32 %v1817_v9, %v1071_v24 }
 0x3a0   : > { %v1608_v26 = vpop.eup %1607  ;;  %1619 = vtanh.f32 %v1080_v23 }
 0x3a1   : > { %v1610_v27 = vpop.eup %1609  ;;  %1621 = vtanh.f32 %v1072_v25 }
 0x3a2   : > { %v1612_v28 = vpop.eup %1611 }
 0x3a3   : > { %v1614_v29 = vpop.eup %1613  ;;  %v1368_v30 = vpack.c.bf16 %v1612_v28, %v1608_v26  ;;  %v1563_v31 = vpop.f32.mrb[24].mxu1 }
 0x3a4   : > { %v1363_v32 = vpack.c.bf16 %v1614_v29, %v1610_v27  ;;  %v1093_v33 = vadd.f32 %v1563_v31, %v1817_v9  ;;  %v1084_v34 = vpop.f32.mrb[25].mxu1 }
 0x3a5   : > { %1400 = vst [vmem:[%s1832_s21 + $0x8] sm:$0xff] %v1368_v30   ;;  %v1085_v35 = vadd.f32 %v1817_v9, %v1084_v34  ;;  %v1564_v36 = vpop.f32.mrb[26].mxu1 }
 0x3a6   : > { %1364 = vst [vmem:[%s1832_s21] sm:$0xff] %v1363_v32   ;;  %1623 = vtanh.f32 %v1093_v33  ;;  %v1096_v37 = vadd.f32 %v1564_v36, %v1817_v9  ;;  %v1087_v38 = vpop.f32.mrb[27].mxu1 }
 0x3a7   : > { %1625 = vtanh.f32 %v1085_v35  ;;  %v1088_v39 = vadd.f32 %v1817_v9, %v1087_v38 }
 0x3a8   : > { %v1616_v40 = vpop.eup %1615  ;;  %1627 = vtanh.f32 %v1096_v37 }
 0x3a9   : > { %v1618_v41 = vpop.eup %1617  ;;  %1629 = vtanh.f32 %v1088_v39 }
 0x3aa   : > { %v1620_v42 = vpop.eup %1619 }
 0x3ab   : > { %v1622_v43 = vpop.eup %1621  ;;  %v1378_v44 = vpack.c.bf16 %v1620_v42, %v1616_v40  ;;  %v1567_v45 = vpop.f32.mrb[28].mxu1 }
 0x3ac   : > { %v1373_v46 = vpack.c.bf16 %v1622_v43, %v1618_v41  ;;  %v1109_v47 = vadd.f32 %v1567_v45, %v1817_v9  ;;  %v1100_v48 = vpop.f32.mrb[29].mxu1 }
 0x3ad   : > { %1402 = vst [vmem:[%s1832_s21 + $0x18] sm:$0xff] %v1378_v44   ;;  %v1101_v49 = vadd.f32 %v1817_v9, %v1100_v48  ;;  %v1568_v50 = vpop.f32.mrb[30].mxu1 }
 0x3ae   : > { %1401 = vst [vmem:[%s1832_s21 + $0x10] sm:$0xff] %v1373_v46   ;;  %1631 = vtanh.f32 %v1109_v47  ;;  %v1112_v51 = vadd.f32 %v1568_v50, %v1817_v9  ;;  %v1103_v52 = vpop.f32.mrb[31].mxu1 }
 0x3af   : > { %1633 = vtanh.f32 %v1101_v49  ;;  %v1104_v53 = vadd.f32 %v1817_v9, %v1103_v52 }
 0x3b0   : > { %v1624_v54 = vpop.eup %1623  ;;  %1635 = vtanh.f32 %v1112_v51 }
 0x3b1   : > { %v1626_v55 = vpop.eup %1625  ;;  %1637 = vtanh.f32 %v1104_v53 }
 0x3b2   : > { %v1628_v56 = vpop.eup %1627 }
 0x3b3   : > { %v1630_v57 = vpop.eup %1629  ;;  %v1388_v58 = vpack.c.bf16 %v1628_v56, %v1624_v54 }
 0x3b4   : > { %v1383_v59 = vpack.c.bf16 %v1630_v57, %v1626_v55 }
 0x3b5   : > { %1404 = vst [vmem:[%s1832_s21 + $0x28] sm:$0xff] %v1388_v58  }
 0x3b6   : > { %1403 = vst [vmem:[%s1832_s21 + $0x20] sm:$0xff] %v1383_v59  }
 0x3b8   : > { %v1632_v60 = vpop.eup %1631 }
 0x3b9   : > { %v1634_v61 = vpop.eup %1633 }
 0x3ba   : > { %v1636_v62 = vpop.eup %1635 }
 0x3bb   : > { %v1638_v63 = vpop.eup %1637  ;;  %v1398_v0 = vpack.c.bf16 %v1636_v62, %v1632_v60 }
 0x3bc   : > { %v1393_v1 = vpack.c.bf16 %v1638_v63, %v1634_v61 }
 0x3bd   : > { %1406 = vst [vmem:[%s1832_s21 + $0x38] sm:$0xff] %v1398_v0  }
 0x3be   : > { %1405 = vst [vmem:[%s1832_s21 + $0x30] sm:$0xff] %v1393_v1  }
 0x3bf PF: > { %s19_s30 = sadd.s32 1, %s1645_s30  }
 0x3c0   : > { %p16_p4 = scmp.ge.s32.totalorder %s19_s30, 4  }
 0x3c2   :  { %18 = sbr.rel (!%p16_p4) target bundleno = 1 (0x1), region = 86 }

// kernel: mlp_adj_forward.1
= control target key start
LH: loop header
LB: loop body
LE: loop exit
PB: predicated region body
PF: predicated region fallthrough
CT: control target
= control target key end

     0   :  { %s1697_s30 = smov 0   ;;  %s1853_s0 = inlined_call_operand.vmem [shape: bf16[256,128], index: 0, kind: input, shape index: {}]   ;;  %s1854_s1 = inlined_call_operand.vmem [shape: bf16[128,128], index: 1, kind: input, shape index: {}]   ;;  %s1855_s2 = inlined_call_operand.vmem [shape: f32[1,128], index: 2, kind: input, shape index: {}]   ;;  %s1856_s3 = inlined_call_operand.vmem [shape: bf16[128,64], index: 3, kind: input, shape index: {}]   ;;  %s1857_s4 = inlined_call_operand.vmem [shape: f32[1,64], index: 4, kind: input, shape index: {}]   ;;  %s1858_s5 = inlined_call_operand.vmem [shape: bf16[64,32], index: 5, kind: input, shape index: {}]   ;;  %s1859_s6 = inlined_call_operand.vmem [shape: f32[1,32], index: 6, kind: input, shape index: {}]   ;;  %s1860_s7 = inlined_call_operand.vmem [shape: bf16[32,128], index: 7, kind: input, shape index: {}]   ;;  %s1861_s8 = inlined_call_operand.vmem [shape: f32[1,128], index: 8, kind: input, shape index: {}]   ;;  %s1862_s9 = inlined_call_operand.vmem [shape: bf16[256,128], index: 9, kind: output, shape index: {}]  }
   0x1 LB: > { %s1267_s10 = sadd.s32 4294967295, %s1645_s30   ;;  %p1271_p0 = scmp.ge.s32.totalorder %s1645_s30, 1  ;;  %s1645_s30 = sphi %s1697_s30, %s19_s30  }
   0x2   : > { %p288_p1 = scmp.lt.s32.totalorder %s1645_s30, 3 }
   0x4   : > { %p289_p2 = pnand %p1271_p0, %p288_p1 }
   0x5   : > { %v1577_v0 = vld [vmem:[%s1854_s1] sm:$0xff] (!%p289_p2)   ;;  %s1272_s13 = sshll.u32 (!%p289_p2), %s1267_s10, 4  ;;  %v1578_v1 = vld [vmem:[%s1854_s1 + $0x8] sm:$0xff] (!%p289_p2)   ;;  %v1579_v2 = vld [vmem:[%s1854_s1 + $0x10] sm:$0xff] (!%p289_p2)   ;;  %vm824_vm0 = vcmask (!%p289_p2), 523264   ;;  %vm993_vm1 = vcmask (!%p289_p2), 261120  }
   0x6   : > { %292 = sbr.rel (%p289_p2) target bundleno = 959 (0x3bf), region = 56  ;;  %p325_p3 = scmp.lt.s32.totalorder (!%p289_p2), %s1272_s13, 31  ;;  %1461 = vmatprep.subr.bf16.mxu0 (!%p289_p2), %v1577_v0  ;;  %v1580_v3 = vld [vmem:[%s1854_s1 + $0x18] sm:$0xff] (!%p289_p2)   ;;  %v1581_v5 = vld [vmem:[%s1854_s1 + $0x20] sm:$0xff] (!%p289_p2)   ;;  %v1582_v6 = vld [vmem:[%s1854_s1 + $0x28] sm:$0xff] (!%p289_p2)  }
   0x7   : > { %1462 = vmatpush3.bf16.msra.mxu0 (!%p289_p2), %v1577_v0  ;;  %v1593_v7 = vld [vmem:[%s1856_s3] sm:$0xff] (!%p289_p2)   ;;  %v1594_v8 = vld [vmem:[%s1856_s3 + $0x8] sm:$0xff] (!%p289_p2)   ;;  %v1583_v9 = vld [vmem:[%s1854_s1 + $0x30] sm:$0xff] (!%p289_p2)  }
   0x8   : > { %1463 = vmatprep.subr.bf16.mxu0 (!%p289_p2), %v1578_v1  ;;  %1493 = vmatprep.subr.bf16.mxu1 (!%p289_p2), %v1593_v7  ;;  %v1595_v10 = vld [vmem:[%s1856_s3 + $0x10] sm:$0xff] (!%p289_p2)   ;;  %v1584_v11 = vld [vmem:[%s1854_s1 + $0x38] sm:$0xff] (!%p289_p2)   ;;  %v1597_v13 = vld [vmem:[%s1856_s3 + $0x20] sm:$0xff] (!%p289_p2)  }
   0x9   : > { %1494 = vmatpush3.bf16.msra.mxu1 (!%p289_p2), %v1593_v7  ;;  %v1596_v12 = vld [vmem:[%s1856_s3 + $0x18] sm:$0xff] (!%p289_p2)   ;;  %v1598_v16 = vld [vmem:[%s1856_s3 + $0x28] sm:$0xff] (!%p289_p2)   ;;  %v1599_v22 = vld [vmem:[%s1856_s3 + $0x30] sm:$0xff] (!%p289_p2)  }
   0xa   : > { %1495 = vmatprep.subr.bf16.mxu1 (!%p289_p2), %v1594_v8  ;;  %v1600_v23 = vld [vmem:[%s1856_s3 + $0x38] sm:$0xff] (!%p289_p2)   ;;  %v1601_v24 = vld [vmem:[%s1858_s5] sm:$0xff] (!%p289_p2)   ;;  %v1602_v25 = vld [vmem:[%s1858_s5 + $0x8] sm:$0xff] (!%p289_p2)  }
   0xb   : > { %1464 = vmatpush3.bf16.msra.mxu0 (!%p289_p2), %v1578_v1  ;;  %v1603_v26 = vld [vmem:[%s1858_s5 + $0x10] sm:$0xff] (!%p289_p2)   ;;  %v1276_v27 = vld [vmem:[%s1855_s2] ss:$0 sm:$0xff] (!%p289_p2) }
   0xc   : > { %1465 = vmatprep.subr.bf16.mxu0 (!%p289_p2), %v1579_v2 }
   0xd   : > { %s1864_s13 = smov (!%p325_p3, %s1272_s13), 31  ;;  %1496 = vmatpush3.bf16.msra.mxu1 %v1594_v8 }
   0xe   : > { %s1273_s18 = sshll.u32 %s1864_s13, 2  ;;  %1497 = vmatprep.subr.bf16.mxu1 %v1595_v10 }
   0xf   : > { %s1722_s21 = scalar_lea.vmem %s1853_s0, %s1273_s18  ;;  %1466 = vmatpush3.bf16.msra.mxu0 %v1579_v2 }
  0x10   : > { %v1585_v4 = vld [vmem:[%s1722_s21] sm:$0xff]   ;;  %1467 = vmatprep.subr.bf16.mxu0 %v1580_v3  ;;  %v1586_v14 = vld [vmem:[%s1722_s21 + $0x8] sm:$0xff]   ;;  %v1587_v15 = vld [vmem:[%s1722_s21 + $0x10] sm:$0xff]  }
  0x11   : > { %1477 = vmatprep.mubr.bf16.mxu0 %v1585_v4  ;;  %1498 = vmatpush3.bf16.msra.mxu1 %v1595_v10  ;;  %v1588_v17 = vld [vmem:[%s1722_s21 + $0x18] sm:$0xff]   ;;  %v1589_v18 = vld [vmem:[%s1722_s21 + $0x20] sm:$0xff]   ;;  %v1590_v19 = vld [vmem:[%s1722_s21 + $0x28] sm:$0xff]  }
  0x12   : > { %1499 = vmatprep.subr.bf16.mxu1 %v1596_v12  ;;  %v1591_v20 = vld [vmem:[%s1722_s21 + $0x30] sm:$0xff]   ;;  %v1592_v21 = vld [vmem:[%s1722_s21 + $0x38] sm:$0xff]   ;;  %s1832_s21 = scalar_lea.vmem %s1862_s9, %s1273_s18 }
  0x13   : > { %1468 = vmatpush3.bf16.msra.mxu0 %v1580_v3 }
  0x14   : > { %1469 = vmatprep.subr.bf16.mxu0 %v1581_v5 }
  0x15   : > { %1500 = vmatpush3.bf16.msra.mxu1 %v1596_v12 }
  0x16   : > { %1501 = vmatprep.subr.bf16.mxu1 %v1597_v13 }
  0x17   : > { %1470 = vmatpush3.bf16.msra.mxu0 %v1581_v5 }
  0x18   : > { %1471 = vmatprep.subr.bf16.mxu0 %v1582_v6 }
  0x19   : > { %1502 = vmatpush3.bf16.msra.mxu1 %v1597_v13 }
  0x1a   : > { %1503 = vmatprep.subr.bf16.mxu1 %v1598_v16 }
  0x1b   : > { %1472 = vmatpush3.bf16.msra.mxu0 %v1582_v6 }
  0x1c   : > { %1473 = vmatprep.subr.bf16.mxu0 %v1583_v9 }
  0x1d   : > { %1504 = vmatpush3.bf16.msra.mxu1 %v1598_v16 }
  0x1e   : > { %1505 = vmatprep.subr.bf16.mxu1 %v1599_v22 }
  0x1f   : > { %1474 = vmatpush3.bf16.msra.mxu0 %v1583_v9 }
  0x20   : > { %1475 = vmatprep.subr.bf16.mxu0 %v1584_v11 }
  0x21   : > { %1506 = vmatpush3.bf16.msra.mxu1 %v1599_v22  ;;  %v1606_v22 = vld [vmem:[%s1860_s7 + $0x8] sm:$0xff]  }
  0x22   : > { %1507 = vmatprep.subr.bf16.mxu1 %v1600_v23 }
  0x23   : > { %1476 = vmatpush3.bf16.msra.mxu0 %v1584_v11 }
  0x24   : > { %1525 = vmatprep.subr.bf16.mxu0 %v1601_v24 }
  0x25   : > { %1508 = vmatpush3.bf16.msra.mxu1 %v1600_v23  ;;  %v1293_v23 = vld [vmem:[%s1857_s4] ss:$0 sm:$0xff] }
  0x26   : > { %1478 = vmatmul.mubr.bf16.vlgmr.msra.gmra.mrb[0].mxu0 %v1586_v14 }
  0x27   : > { %1481 = vmatprep.mubr.bf16.mxu0 %v1587_v15  ;;  %1526 = vmatpush3.bf16.msra.mxu0 %v1601_v24 }
  0x28   : > { %1527 = vmatprep.subr.bf16.mxu0 %v1602_v25 }
  0x2b   : > { %1528 = vmatpush3.bf16.msra.mxu0 %v1602_v25 }
  0x2c   : > { %1529 = vmatprep.subr.bf16.mxu0 %v1603_v26 }
  0x2e   : > { %1482 = vmatmul.mubr.bf16.gmra.mrb[4].mxu0 %v1588_v17 }
  0x2f   : > { %1485 = vmatprep.mubr.bf16.mxu0 %v1589_v18  ;;  %1530 = vmatpush3.bf16.msra.mxu0 %v1603_v26 }
  0x36   : > { %1486 = vmatmul.mubr.bf16.gmra.mrb[8].mxu0 %v1590_v19 }
  0x37   : > { %1489 = vmatprep.mubr.bf16.mxu0 %v1591_v20  ;;  %v1604_v20 = vld [vmem:[%s1858_s5 + $0x18] sm:$0xff]  }
  0x38   : > { %1531 = vmatprep.subr.bf16.mxu0 %v1604_v20 }
  0x39   : > { %1532 = vmatpush3.bf16.msra.mxu0 %v1604_v20 }
  0x3e   : > { %1490 = vmatmul.mubr.bf16.gmra.mrb[12].mxu0 %v1592_v21  ;;  %v1605_v21 = vld [vmem:[%s1860_s7] sm:$0xff]  }
  0x3f   : > { %1549 = vmatprep.subr.bf16.mxu1 %v1605_v21 }
  0xf9   : > { %v1479_v28 = vpop.f32.mrb[0].mxu0 }
  0xfa   : > { %v515_v29 = vadd.f32 %v1479_v28, %v1276_v27  ;;  %v506_v30 = vpop.f32.mrb[1].mxu0 }
  0xfb   : > { %v507_v31 = vadd.f32 %v1276_v27, %v506_v30  ;;  %v1480_v32 = vpop.f32.mrb[2].mxu0 }
  0xfc   : > { %v518_v33 = vadd.f32 %v1480_v32, %v1276_v27  ;;  %v509_v34 = vpop.f32.mrb[3].mxu0  ;;  %v571_v36 = vmax.f32 %v515_v29, 0.0 }
  0xfd   : > { %v510_v35 = vadd.f32 %v1276_v27, %v509_v34  ;;  %v569_v38 = vmax.f32 %v507_v31, 0.0 }
  0xfe   : > { %v572_v37 = vmax.f32 %v518_v33, 0.0 }
  0xff   : > { %v570_v39 = vmax.f32 %v510_v35, 0.0 }
 0x100   : > { %v586_v40 = vpack.c.bf16 %v572_v37, %v571_v36 }
 0x101   : > { %v1483_v41 = vpop.f32.mrb[4].mxu0  ;;  %v585_v42 = vpack.c.bf16 %v570_v39, %v569_v38 }
 0x102   : > { %v531_v43 = vadd.f32 %v1483_v41, %v1276_v27  ;;  %v522_v44 = vpop.f32.mrb[5].mxu0 }
 0x103   : > { %v523_v45 = vadd.f32 %v1276_v27, %v522_v44  ;;  %v1484_v46 = vpop.f32.mrb[6].mxu0  ;;  %1509 = vmatprep.mubr.bf16.mxu1 %v585_v42 }
 0x104   : > { %v534_v47 = vadd.f32 %v1484_v46, %v1276_v27  ;;  %v525_v48 = vpop.f32.mrb[7].mxu0  ;;  %1510 = vmatmul.mubr.bf16.vlgmr.msra.gmra.mrb[0].mxu1 %v586_v40  ;;  %v575_v50 = vmax.f32 %v531_v43, 0.0 }
 0x105   : > { %v526_v49 = vadd.f32 %v1276_v27, %v525_v48  ;;  %v573_v52 = vmax.f32 %v523_v45, 0.0  ;;  %1550 = vmatpush3.bf16.msra.mxu1 %v1605_v21 }
 0x106   : > { %v576_v51 = vmax.f32 %v534_v47, 0.0  ;;  %1551 = vmatprep.subr.bf16.mxu1 %v1606_v22 }
 0x107   : > { %v574_v53 = vmax.f32 %v526_v49, 0.0 }
 0x108   : > { %v588_v54 = vpack.c.bf16 %v576_v51, %v575_v50 }
 0x109   : > { %v587_v55 = vpack.c.bf16 %v574_v53, %v573_v52  ;;  %v1487_v56 = vpop.f32.mrb[8].mxu0  ;;  %1552 = vmatpush3.bf16.msra.mxu1 %v1606_v22 }
 0x10a   : > { %v547_v57 = vadd.f32 %v1487_v56, %v1276_v27  ;;  %v538_v58 = vpop.f32.mrb[9].mxu0 }
 0x10b   : > { %v539_v59 = vadd.f32 %v1276_v27, %v538_v58  ;;  %v1488_v60 = vpop.f32.mrb[10].mxu0  ;;  %1513 = vmatprep.mubr.bf16.mxu1 %v587_v55 }
 0x10c   : > { %v550_v61 = vadd.f32 %v1488_v60, %v1276_v27  ;;  %v541_v62 = vpop.f32.mrb[11].mxu0  ;;  %1514 = vmatmul.mubr.bf16.gmra.mrb[4].mxu1 %v588_v54  ;;  %v579_v0 = vmax.f32 %v547_v57, 0.0 }
 0x10d   : > { %v542_v63 = vadd.f32 %v1276_v27, %v541_v62  ;;  %v577_v2 = vmax.f32 %v539_v59, 0.0 }
 0x10e   : > { %v580_v1 = vmax.f32 %v550_v61, 0.0 }
 0x10f   : > { %v578_v3 = vmax.f32 %v542_v63, 0.0 }
 0x110   : > { %v590_v4 = vpack.c.bf16 %v580_v1, %v579_v0 }
 0x111   : > { %v589_v5 = vpack.c.bf16 %v578_v3, %v577_v2  ;;  %v1491_v6 = vpop.f32.mrb[12].mxu0 }
 0x112   : > { %v563_v7 = vadd.f32 %v1491_v6, %v1276_v27  ;;  %v554_v8 = vpop.f32.mrb[13].mxu0 }
 0x113   : > { %v555_v9 = vadd.f32 %v1276_v27, %v554_v8  ;;  %v1492_v10 = vpop.f32.mrb[14].mxu0  ;;  %1517 = vmatprep.mubr.bf16.mxu1 %v589_v5 }
 0x114   : > { %v566_v11 = vadd.f32 %v1492_v10, %v1276_v27  ;;  %v557_v12 = vpop.f32.mrb[15].mxu0  ;;  %1518 = vmatmul.mubr.bf16.gmra.mrb[8].mxu1 %v590_v4  ;;  %v583_v14 = vmax.f32 %v563_v7, 0.0 }
 0x115   : > { %v558_v13 = vadd.f32 %v1276_v27, %v557_v12  ;;  %v581_v16 = vmax.f32 %v555_v9, 0.0 }
 0x116   : > { %v584_v15 = vmax.f32 %v566_v11, 0.0 }
 0x117   : > { %v582_v17 = vmax.f32 %v558_v13, 0.0 }
 0x118   : > { %v592_v18 = vpack.c.bf16 %v584_v15, %v583_v14 }
 0x119   : > { %v591_v19 = vpack.c.bf16 %v582_v17, %v581_v16  ;;  %v1302_v16 = vld [vmem:[%s1859_s6] ss:$0 sm:$0xff] }
 0x11b   : > { %1521 = vmatprep.mubr.bf16.mxu1 %v591_v19 }
 0x11c   : > { %1522 = vmatmul.mubr.bf16.gmra.mrb[12].mxu1 %v592_v18 }
 0x1d7   : > { %v1511_v24 = vpop.f32.mrb[0].mxu1 }
 0x1d8   : > { %v707_v25 = vadd.f32 %v1511_v24, %v1293_v23  ;;  %v698_v26 = vpop.f32.mrb[1].mxu1 }
 0x1d9   : > { %v699_v27 = vadd.f32 %v1293_v23, %v698_v26  ;;  %v1512_v28 = vpop.f32.mrb[2].mxu1 }
 0x1da   : > { %v710_v29 = vadd.f32 %v1512_v28, %v1293_v23  ;;  %v701_v30 = vpop.f32.mrb[3].mxu1  ;;  %v763_v32 = vmax.f32 %v707_v25, 0.0 }
 0x1db   : > { %v702_v31 = vadd.f32 %v1293_v23, %v701_v30  ;;  %v761_v34 = vmax.f32 %v699_v27, 0.0 }
 0x1dc   : > { %v764_v33 = vmax.f32 %v710_v29, 0.0 }
 0x1dd   : > { %v762_v35 = vmax.f32 %v702_v31, 0.0 }
 0x1de   : > { %v778_v36 = vpack.c.bf16 %v764_v33, %v763_v32 }
 0x1df   : > { %v777_v37 = vpack.c.bf16 %v762_v35, %v761_v34  ;;  %v1515_v38 = vpop.f32.mrb[4].mxu1 }
 0x1e0   : > { %v723_v39 = vadd.f32 %v1515_v38, %v1293_v23  ;;  %v714_v40 = vpop.f32.mrb[5].mxu1 }
 0x1e1   : > { %v715_v41 = vadd.f32 %v1293_v23, %v714_v40  ;;  %v1516_v42 = vpop.f32.mrb[6].mxu1  ;;  %1533 = vmatprep.mubr.msk.bf16.mxu0 %vm824_vm0, %v777_v37 }
 0x1e2   : > { %v726_v43 = vadd.f32 %v1516_v42, %v1293_v23  ;;  %v717_v44 = vpop.f32.mrb[7].mxu1  ;;  %1534 = vmatmul.mubr.msk.bf16.vlgmr.msra.gmra.mrb[16].mxu0 %vm824_vm0, %v778_v36  ;;  %v767_v46 = vmax.f32 %v723_v39, 0.0 }
 0x1e3   : > { %v718_v45 = vadd.f32 %v1293_v23, %v717_v44  ;;  %v765_v48 = vmax.f32 %v715_v41, 0.0 }
 0x1e4   : > { %v768_v47 = vmax.f32 %v726_v43, 0.0 }
 0x1e5   : > { %v766_v49 = vmax.f32 %v718_v45, 0.0 }
 0x1e6   : > { %v780_v50 = vpack.c.bf16 %v768_v47, %v767_v46 }
 0x1e7   : > { %v779_v51 = vpack.c.bf16 %v766_v49, %v765_v48  ;;  %v1519_v52 = vpop.f32.mrb[8].mxu1 }
 0x1e8   : > { %v739_v53 = vadd.f32 %v1519_v52, %v1293_v23  ;;  %v730_v54 = vpop.f32.mrb[9].mxu1 }
 0x1e9   : > { %v731_v55 = vadd.f32 %v1293_v23, %v730_v54  ;;  %v1520_v56 = vpop.f32.mrb[10].mxu1  ;;  %1537 = vmatprep.mubr.msk.bf16.mxu0 %vm824_vm0, %v779_v51 }
 0x1ea   : > { %v742_v57 = vadd.f32 %v1520_v56, %v1293_v23  ;;  %v733_v58 = vpop.f32.mrb[11].mxu1  ;;  %1538 = vmatmul.mubr.msk.bf16.gmra.mrb[20].mxu0 %vm824_vm0, %v780_v50  ;;  %v771_v60 = vmax.f32 %v739_v53, 0.0 }
 0x1eb   : > { %v734_v59 = vadd.f32 %v1293_v23, %v733_v58  ;;  %v769_v62 = vmax.f32 %v731_v55, 0.0 }
 0x1ec   : > { %v772_v61 = vmax.f32 %v742_v57, 0.0 }
 0x1ed   : > { %v770_v63 = vmax.f32 %v734_v59, 0.0 }
 0x1ee   : > { %v782_v0 = vpack.c.bf16 %v772_v61, %v771_v60 }
 0x1ef   : > { %v781_v1 = vpack.c.bf16 %v770_v63, %v769_v62  ;;  %v1523_v2 = vpop.f32.mrb[12].mxu1 }
 0x1f0   : > { %v755_v3 = vadd.f32 %v1523_v2, %v1293_v23  ;;  %v746_v4 = vpop.f32.mrb[13].mxu1 }
 0x1f1   : > { %v747_v5 = vadd.f32 %v1293_v23, %v746_v4  ;;  %v1524_v6 = vpop.f32.mrb[14].mxu1  ;;  %1541 = vmatprep.mubr.msk.bf16.mxu0 %vm824_vm0, %v781_v1 }
 0x1f2   : > { %v758_v7 = vadd.f32 %v1524_v6, %v1293_v23  ;;  %v749_v8 = vpop.f32.mrb[15].mxu1  ;;  %1542 = vmatmul.mubr.msk.bf16.gmra.mrb[24].mxu0 %vm824_vm0, %v782_v0  ;;  %v775_v10 = vmax.f32 %v755_v3, 0.0 }
 0x1f3   : > { %v750_v9 = vadd.f32 %v1293_v23, %v749_v8  ;;  %v773_v12 = vmax.f32 %v747_v5, 0.0 }
 0x1f4   : > { %v776_v11 = vmax.f32 %v758_v7, 0.0 }
 0x1f5   : > { %v774_v13 = vmax.f32 %v750_v9, 0.0  ;;  %v1817_v9 = vld [vmem:[%s1861_s8] ss:$0 sm:$0xff] }
 0x1f6   : > { %v784_v14 = vpack.c.bf16 %v776_v11, %v775_v10 }
 0x1f7   : > { %v783_v15 = vpack.c.bf16 %v774_v13, %v773_v12 }
 0x1f9   : > { %1545 = vmatprep.mubr.msk.bf16.mxu0 %vm824_vm0, %v783_v15 }
 0x1fa   : > { %1546 = vmatmul.mubr.msk.bf16.gmra.mrb[28].mxu0 %vm824_vm0, %v784_v14 }
 0x2b5   : > { %v1535_v17 = vpop.f32.mrb[16].mxu0 }
 0x2b6   : > { %v892_v18 = vadd.f32 %v1535_v17, %v1302_v16  ;;  %v883_v19 = vpop.f32.mrb[17].mxu0 }
 0x2b7   : > { %v884_v20 = vadd.f32 %v1302_v16, %v883_v19  ;;  %v1536_v21 = vpop.f32.mrb[18].mxu0 }
 0x2b8   : > { %v895_v22 = vadd.f32 %v1536_v21, %v1302_v16  ;;  %v886_v23 = vpop.f32.mrb[19].mxu0  ;;  %v948_v25 = vmax.f32 %v892_v18, 0.0 }
 0x2b9   : > { %v887_v24 = vadd.f32 %v1302_v16, %v886_v23  ;;  %v946_v27 = vmax.f32 %v884_v20, 0.0 }
 0x2ba   : > { %v949_v26 = vmax.f32 %v895_v22, 0.0 }
 0x2bb   : > { %v947_v28 = vmax.f32 %v887_v24, 0.0 }
 0x2bc   : > { %v963_v29 = vpack.c.bf16 %v949_v26, %v948_v25 }
 0x2bd   : > { %v962_v30 = vpack.c.bf16 %v947_v28, %v946_v27  ;;  %v1539_v31 = vpop.f32.mrb[20].mxu0 }
 0x2be   : > { %v908_v32 = vadd.f32 %v1539_v31, %v1302_v16  ;;  %v899_v33 = vpop.f32.mrb[21].mxu0 }
 0x2bf   : > { %v900_v34 = vadd.f32 %v1302_v16, %v899_v33  ;;  %v1540_v35 = vpop.f32.mrb[22].mxu0  ;;  %1553 = vmatprep.mubr.msk.bf16.mxu1 %vm993_vm1, %v962_v30 }
 0x2c0   : > { %v911_v36 = vadd.f32 %v1540_v35, %v1302_v16  ;;  %v902_v37 = vpop.f32.mrb[23].mxu0  ;;  %1554 = vmatmul.mubr.msk.bf16.vlgmr.msra.gmra.mrb[16].mxu1 %vm993_vm1, %v963_v29  ;;  %v952_v39 = vmax.f32 %v908_v32, 0.0 }
 0x2c1   : > { %v903_v38 = vadd.f32 %v1302_v16, %v902_v37  ;;  %v950_v41 = vmax.f32 %v900_v34, 0.0 }
 0x2c2   : > { %v953_v40 = vmax.f32 %v911_v36, 0.0 }
 0x2c3   : > { %v951_v42 = vmax.f32 %v903_v38, 0.0 }
 0x2c4   : > { %v965_v43 = vpack.c.bf16 %v953_v40, %v952_v39 }
 0x2c5   : > { %v964_v44 = vpack.c.bf16 %v951_v42, %v950_v41  ;;  %v1543_v45 = vpop.f32.mrb[24].mxu0 }
 0x2c6   : > { %v924_v46 = vadd.f32 %v1543_v45, %v1302_v16  ;;  %v915_v47 = vpop.f32.mrb[25].mxu0 }
 0x2c7   : > { %v916_v48 = vadd.f32 %v1302_v16, %v915_v47  ;;  %v1544_v49 = vpop.f32.mrb[26].mxu0  ;;  %1557 = vmatprep.mubr.msk.bf16.mxu1 %vm993_vm1, %v964_v44 }
 0x2c8   : > { %v927_v50 = vadd.f32 %v1544_v49, %v1302_v16  ;;  %v918_v51 = vpop.f32.mrb[27].mxu0  ;;  %1558 = vmatmul.mubr.msk.bf16.gmra.mrb[20].mxu1 %vm993_vm1, %v965_v43  ;;  %v956_v53 = vmax.f32 %v924_v46, 0.0 }
 0x2c9   : > { %v919_v52 = vadd.f32 %v1302_v16, %v918_v51  ;;  %v954_v55 = vmax.f32 %v916_v48, 0.0 }
 0x2ca   : > { %v957_v54 = vmax.f32 %v927_v50, 0.0 }
 0x2cb   : > { %v955_v56 = vmax.f32 %v919_v52, 0.0 }
 0x2cc   : > { %v967_v57 = vpack.c.bf16 %v957_v54, %v956_v53 }
 0x2cd   : > { %v966_v58 = vpack.c.bf16 %v955_v56, %v954_v55  ;;  %v1547_v59 = vpop.f32.mrb[28].mxu0 }
 0x2ce   : > { %v940_v60 = vadd.f32 %v1547_v59, %v1302_v16  ;;  %v931_v61 = vpop.f32.mrb[29].mxu0 }
 0x2cf   : > { %v932_v62 = vadd.f32 %v1302_v16, %v931_v61  ;;  %v1548_v63 = vpop.f32.mrb[30].mxu0  ;;  %1561 = vmatprep.mubr.msk.bf16.mxu1 %vm993_vm1, %v966_v58 }
 0x2d0   : > { %v943_v0 = vadd.f32 %v1548_v63, %v1302_v16  ;;  %v934_v1 = vpop.f32.mrb[31].mxu0  ;;  %1562 = vmatmul.mubr.msk.bf16.gmra.mrb[24].mxu1 %vm993_vm1, %v967_v57  ;;  %v960_v3 = vmax.f32 %v940_v60, 0.0 }
 0x2d1   : > { %v935_v2 = vadd.f32 %v1302_v16, %v934_v1  ;;  %v958_v5 = vmax.f32 %v932_v62, 0.0 }
 0x2d2   : > { %v961_v4 = vmax.f32 %v943_v0, 0.0 }
 0x2d3   : > { %v959_v6 = vmax.f32 %v935_v2, 0.0 }
 0x2d4   : > { %v969_v7 = vpack.c.bf16 %v961_v4, %v960_v3 }
 0x2d5   : > { %v968_v8 = vpack.c.bf16 %v959_v6, %v958_v5 }
 0x2d7   : > { %1565 = vmatprep.mubr.msk.bf16.mxu1 %vm993_vm1, %v968_v8 }
 0x2d8   : > { %1566 = vmatmul.mubr.msk.bf16.gmra.mrb[28].mxu1 %vm993_vm1, %v969_v7 }
 0x393   : > { %v1555_v10 = vpop.f32.mrb[16].mxu1 }
 0x394   : > { %v1061_v11 = vadd.f32 %v1555_v10, %v1817_v9  ;;  %v1052_v12 = vpop.f32.mrb[17].mxu1 }
 0x395   : > { %v1053_v13 = vadd.f32 %v1817_v9, %v1052_v12  ;;  %v1556_v14 = vpop.f32.mrb[18].mxu1 }
 0x396   : > { %1607 = vtanh.f32 %v1061_v11  ;;  %v1064_v15 = vadd.f32 %v1556_v14, %v1817_v9  ;;  %v1055_v16 = vpop.f32.mrb[19].mxu1 }
 0x397   : > { %1609 = vtanh.f32 %v1053_v13  ;;  %v1056_v17 = vadd.f32 %v1817_v9, %v1055_v16 }
 0x398   : > { %1611 = vtanh.f32 %v1064_v15 }
 0x399   : > { %1613 = vtanh.f32 %v1056_v17 }
 0x39b   : > { %v1559_v18 = vpop.f32.mrb[20].mxu1 }
 0x39c   : > { %v1077_v19 = vadd.f32 %v1559_v18, %v1817_v9  ;;  %v1068_v20 = vpop.f32.mrb[21].mxu1 }
 0x39d   : > { %v1069_v21 = vadd.f32 %v1817_v9, %v1068_v20  ;;  %v1560_v22 = vpop.f32.mrb[22].mxu1 }
 0x39e   : > { %1615 = vtanh.f32 %v1077_v19  ;;  %v1080_v23 = vadd.f32 %v1560_v22, %v1817_v9  ;;  %v1071_v24 = vpop.f32.mrb[23].mxu1 }
 0x39f   : > { %1617 = vtanh.f32 %v1069_v21  ;;  %v1072_v25 = vadd.f32 %v1817_v9, %v1071_v24 }
 0x3a0   : > { %v1608_v26 = vpop.eup %1607  ;;  %1619 = vtanh.f32 %v1080_v23 }
 0x3a1   : > { %v1610_v27 = vpop.eup %1609  ;;  %1621 = vtanh.f32 %v1072_v25 }
 0x3a2   : > { %v1612_v28 = vpop.eup %1611 }
 0x3a3   : > { %v1614_v29 = vpop.eup %1613  ;;  %v1368_v30 = vpack.c.bf16 %v1612_v28, %v1608_v26  ;;  %v1563_v31 = vpop.f32.mrb[24].mxu1 }
 0x3a4   : > { %v1363_v32 = vpack.c.bf16 %v1614_v29, %v1610_v27  ;;  %v1093_v33 = vadd.f32 %v1563_v31, %v1817_v9  ;;  %v1084_v34 = vpop.f32.mrb[25].mxu1 }
 0x3a5   : > { %1400 = vst [vmem:[%s1832_s21 + $0x8] sm:$0xff] %v1368_v30   ;;  %v1085_v35 = vadd.f32 %v1817_v9, %v1084_v34  ;;  %v1564_v36 = vpop.f32.mrb[26].mxu1 }
 0x3a6   : > { %1364 = vst [vmem:[%s1832_s21] sm:$0xff] %v1363_v32   ;;  %1623 = vtanh.f32 %v1093_v33  ;;  %v1096_v37 = vadd.f32 %v1564_v36, %v1817_v9  ;;  %v1087_v38 = vpop.f32.mrb[27].mxu1 }
 0x3a7   : > { %1625 = vtanh.f32 %v1085_v35  ;;  %v1088_v39 = vadd.f32 %v1817_v9, %v1087_v38 }
 0x3a8   : > { %v1616_v40 = vpop.eup %1615  ;;  %1627 = vtanh.f32 %v1096_v37 }
 0x3a9   : > { %v1618_v41 = vpop.eup %1617  ;;  %1629 = vtanh.f32 %v1088_v39 }
 0x3aa   : > { %v1620_v42 = vpop.eup %1619 }
 0x3ab   : > { %v1622_v43 = vpop.eup %1621  ;;  %v1378_v44 = vpack.c.bf16 %v1620_v42, %v1616_v40  ;;  %v1567_v45 = vpop.f32.mrb[28].mxu1 }
 0x3ac   : > { %v1373_v46 = vpack.c.bf16 %v1622_v43, %v1618_v41  ;;  %v1109_v47 = vadd.f32 %v1567_v45, %v1817_v9  ;;  %v1100_v48 = vpop.f32.mrb[29].mxu1 }
 0x3ad   : > { %1402 = vst [vmem:[%s1832_s21 + $0x18] sm:$0xff] %v1378_v44   ;;  %v1101_v49 = vadd.f32 %v1817_v9, %v1100_v48  ;;  %v1568_v50 = vpop.f32.mrb[30].mxu1 }
 0x3ae   : > { %1401 = vst [vmem:[%s1832_s21 + $0x10] sm:$0xff] %v1373_v46   ;;  %1631 = vtanh.f32 %v1109_v47  ;;  %v1112_v51 = vadd.f32 %v1568_v50, %v1817_v9  ;;  %v1103_v52 = vpop.f32.mrb[31].mxu1 }
 0x3af   : > { %1633 = vtanh.f32 %v1101_v49  ;;  %v1104_v53 = vadd.f32 %v1817_v9, %v1103_v52 }
 0x3b0   : > { %v1624_v54 = vpop.eup %1623  ;;  %1635 = vtanh.f32 %v1112_v51 }
 0x3b1   : > { %v1626_v55 = vpop.eup %1625  ;;  %1637 = vtanh.f32 %v1104_v53 }
 0x3b2   : > { %v1628_v56 = vpop.eup %1627 }
 0x3b3   : > { %v1630_v57 = vpop.eup %1629  ;;  %v1388_v58 = vpack.c.bf16 %v1628_v56, %v1624_v54 }
 0x3b4   : > { %v1383_v59 = vpack.c.bf16 %v1630_v57, %v1626_v55 }
 0x3b5   : > { %1404 = vst [vmem:[%s1832_s21 + $0x28] sm:$0xff] %v1388_v58  }
 0x3b6   : > { %1403 = vst [vmem:[%s1832_s21 + $0x20] sm:$0xff] %v1383_v59  }
 0x3b8   : > { %v1632_v60 = vpop.eup %1631 }
 0x3b9   : > { %v1634_v61 = vpop.eup %1633 }
 0x3ba   : > { %v1636_v62 = vpop.eup %1635 }
 0x3bb   : > { %v1638_v63 = vpop.eup %1637  ;;  %v1398_v0 = vpack.c.bf16 %v1636_v62, %v1632_v60 }
 0x3bc   : > { %v1393_v1 = vpack.c.bf16 %v1638_v63, %v1634_v61 }
 0x3bd   : > { %1406 = vst [vmem:[%s1832_s21 + $0x38] sm:$0xff] %v1398_v0  }
 0x3be   : > { %1405 = vst [vmem:[%s1832_s21 + $0x30] sm:$0xff] %v1393_v1  }
 0x3bf PF: > { %s19_s30 = sadd.s32 1, %s1645_s30  }
 0x3c0   : > { %p16_p4 = scmp.ge.s32.totalorder %s19_s30, 4  }
 0x3c2   :  { %18 = sbr.rel (!%p16_p4) target bundleno = 1 (0x1), region = 86 }

</bundles_post_ra>
